<compile_context>
chip_gen: v7x
topology: tpu7x:2x2x1
jax: 0.10.0
libtpu: 0.0.40
codegen_flags: <defaults>
</compile_context>

<pallas_src>
import functools

import jax
import jax.numpy as jnp
from jax import lax
from jax.experimental import pallas as pl
from jax.experimental.pallas import tpu as pltpu

LN_EPS = 1e-12  # BERT default


def _layernorm(x, gamma, beta):
    mu = jnp.mean(x, axis=-1, keepdims=True)
    var = jnp.mean((x - mu) ** 2, axis=-1, keepdims=True)
    return (x - mu) * lax.rsqrt(var + LN_EPS) * gamma + beta


# ----------------------------- fused encoder kernel -------------------------
# grid = (L,).  One invocation == one encoder layer over the FULL batch.
# act_ref (VMEM scratch, (B*S, H) bf16) carries activations across layers.


def encoder_kernel(x_ref, amask_ref, wqkv_ref, bqkv_ref, wo_ref,
                   w1_ref, b1_ref, w2_ref, vecs_ref,
                   o_ref, act_ref, attn_ref, *, num_heads):
    layer = pl.program_id(0)
    n_layers = pl.num_programs(0)
    B = amask_ref.shape[0]
    BS, H = act_ref.shape
    S = BS // B
    hd = H // num_heads

    # packed per-layer small params: rows =
    #   0: bo, 1: ln1_g, 2: ln1_b, 3: b2, 4: ln2_g, 5: ln2_b,
    #   6: emb_ln_g, 7: emb_ln_b (rows 6/7 only read at layer 0)
    vecs = vecs_ref[...]                                   # (8, H) f32
    bo, ln1_g, ln1_b = vecs[0:1], vecs[1:2], vecs[2:3]
    b2, ln2_g, ln2_b = vecs[3:4], vecs[4:5], vecs[5:6]

    # ---- layer 0: fused embedding LayerNorm seeds the resident activations --
    @pl.when(layer == 0)
    def _():
        emb = x_ref[...].astype(jnp.float32)               # (B*S, H)
        act_ref[...] = _layernorm(emb, vecs[6:7], vecs[7:8]).astype(act_ref.dtype)

    x_bf = act_ref[...]                                    # (B*S, H) bf16
    x_f32 = x_bf.astype(jnp.float32)

    # ---- fused QKV projection: one MXU call over the whole batch ------------
    # (scale 1/sqrt(hd) already folded into the Q columns of wqkv at init)
    qkv = (jnp.dot(x_bf, wqkv_ref[...], preferred_element_type=jnp.float32)
           + bqkv_ref[...]).astype(jnp.bfloat16)           # (B*S, 3H) bf16

    # ---- attention: per batch row, per head; head context folded through W_O
    for b in range(B):
        row = b * S
        qkv_b = qkv[row:row + S, :]                        # (S, 3H)
        neg_b = amask_ref[b]                               # (1, S) additive mask
        acc = None
        for h in range(num_heads):
            lo = h * hd
            q_h = qkv_b[:, lo:lo + hd]
            k_h = qkv_b[:, H + lo:H + lo + hd]
            v_h = qkv_b[:, 2 * H + lo:2 * H + lo + hd]

            # q @ k^T without an explicit transpose: contract last axes.
            s = lax.dot_general(q_h, k_h, (((1,), (1,)), ((), ())),
                                preferred_element_type=jnp.float32) + neg_b
            m = jnp.max(s, axis=-1, keepdims=True)
            e = jnp.exp(s - m)
            p_att = e * pl.reciprocal(jnp.sum(e, axis=-1, keepdims=True),
                                      approx=True)
            ctx_h = jnp.dot(p_att.astype(jnp.bfloat16), v_h,
                            preferred_element_type=jnp.float32)      # (S, hd)
            # fold this head straight through its W_O rows (sublane-aligned
            # weight slice) -> no 64-lane masked stores into a ctx slab.
            part = jnp.dot(ctx_h.astype(jnp.bfloat16), wo_ref[lo:lo + hd, :],
                           preferred_element_type=jnp.float32)       # (S, H)
            acc = part if acc is None else acc + part
        attn_ref[row:row + S, :] = acc                     # lane-dense (S, H) store

    h1 = _layernorm(x_f32 + attn_ref[...] + bo, ln1_g, ln1_b)   # (B*S, H)

    # ---- feed-forward (batch folded into M) ----------------------------------
    ff = jnp.dot(h1.astype(jnp.bfloat16), w1_ref[...],
                 preferred_element_type=jnp.float32) + b1_ref[...]
    ff = jax.nn.gelu(ff, approximate=True)                 # tanh GELU -> EUP
    ff = jnp.dot(ff.astype(jnp.bfloat16), w2_ref[...],
                 preferred_element_type=jnp.float32) + b2
    y = _layernorm(h1 + ff, ln2_g, ln2_b)

    act_ref[...] = y.astype(act_ref.dtype)

    # ---- final layer: emit last_hidden_state[:, :-1] directly ---------------
    @pl.when(layer == n_layers - 1)
    def _():
        for b in range(B):
            o_ref[b, :, :] = y[b * S:b * S + S - 1, :].astype(o_ref.dtype)


def bert_encoder(x2d, add_mask, p, num_heads):
    """x2d: (B*S, H) bf16 embeddings, add_mask: (B, 1, S) f32 additive mask.

    Returns last_hidden_state[:, :-1] of shape (B, S-1, H) f32.
    """
    BS, H = x2d.shape
    B = add_mask.shape[0]
    S = add_mask.shape[2]
    L, _, F = p["w1"].shape

    def per_layer(shape):
        # layer-stacked weight: streamed once per grid step (per layer)
        return pl.BlockSpec((pl.Squeezed(),) + shape,
                            lambda l: (l,) + (0,) * len(shape))

    kernel = functools.partial(encoder_kernel, num_heads=num_heads)
    return pl.pallas_call(
        kernel,
        out_shape=jax.ShapeDtypeStruct((B, S - 1, H), jnp.float32),
        grid=(L,),
        in_specs=[
            pl.BlockSpec((BS, H), lambda l: (0, 0)),      # embeddings (resident)
            pl.BlockSpec((B, 1, S), lambda l: (0, 0, 0)),  # additive attn mask
            per_layer((H, 3 * H)),                         # wqkv (scale folded)
            per_layer((1, 3 * H)),                         # bqkv
            per_layer((H, H)),                             # wo
            per_layer((H, F)),                             # w1
            per_layer((1, F)),                             # b1
            per_layer((F, H)),                             # w2
            per_layer((8, H)),                             # packed small params
        ],
        out_specs=pl.BlockSpec((B, S - 1, H), lambda l: (0, 0, 0)),
        scratch_shapes=[
            pltpu.VMEM((BS, H), jnp.bfloat16),   # residual stream across layers
            pltpu.VMEM((BS, H), jnp.float32),    # per-layer attention output
        ],
        compiler_params=pltpu.CompilerParams(
            dimension_semantics=("arbitrary",),
            vmem_limit_bytes=48 * 1024 * 1024,   # fits v7x (64 MiB) and v5e/v6e
        ),
    )(x2d, add_mask, p["wqkv"], p["bqkv"], p["wo"],
      p["w1"], p["b1"], p["w2"], p["vecs"])


# ----------------------------- parameter init (deterministic, synthetic) ----


def init_params(key, vocab, max_pos, H, F, n_layers, num_heads):
    def nrm(k, shape, scale=0.02):
        return (scale * jax.random.normal(k, shape)).astype(jnp.float32)

    hd = H // num_heads
    k_word, k_pos, k_type, k_qkv, k_o, k_1, k_2 = jax.random.split(key, 7)

    wqkv = nrm(k_qkv, (n_layers, H, 3 * H))
    # Fold 1/sqrt(head_dim) into the Q columns -> no per-head scale in-kernel.
    wqkv = wqkv.at[:, :, :H].multiply(1.0 / float(hd) ** 0.5)

    # Packed small per-layer params (rows documented in encoder_kernel).
    vecs = jnp.zeros((n_layers, 8, H), jnp.float32)
    vecs = vecs.at[:, 1].set(1.0)   # ln1 gamma
    vecs = vecs.at[:, 4].set(1.0)   # ln2 gamma
    vecs = vecs.at[:, 6].set(1.0)   # embedding-LN gamma (layer 0 only)

    return {
        "word_emb": nrm(k_word, (vocab, H)),
        "pos_emb": nrm(k_pos, (max_pos, H)),
        "type_emb": nrm(k_type, (2, H)),
        # per-layer weights stacked along a leading layer axis; matmul weights bf16
        "wqkv": wqkv.astype(jnp.bfloat16),
        "bqkv": jnp.zeros((n_layers, 1, 3 * H), jnp.float32),
        "wo": nrm(k_o, (n_layers, H, H)).astype(jnp.bfloat16),
        "w1": nrm(k_1, (n_layers, H, F)).astype(jnp.bfloat16),
        "b1": jnp.zeros((n_layers, 1, F), jnp.float32),
        "w2": nrm(k_2, (n_layers, F, H)).astype(jnp.bfloat16),
        "vecs": vecs,
    }


# ----------------------------- forward (== PretrainedLanguageModel.forward) -


def plm_forward(params, input_ids, attention_mask, num_heads):
    B, S = input_ids.shape
    H = params["word_emb"].shape[1]
    # Embedding gathers are glue (plain JAX). Everything downstream — embedding
    # LayerNorm and all encoder layers — runs in a single fused Pallas call.
    emb = (params["word_emb"][input_ids]
           + params["pos_emb"][:S][None, :, :]
           + params["type_emb"][0][None, None, :])          # token_type_ids == 0
    x2d = emb.astype(jnp.bfloat16).reshape(B * S, H)
    add_mask = ((1.0 - attention_mask.astype(jnp.float32)) * (-1e9)).reshape(B, 1, S)
    # Kernel writes last_hidden_state[:, :-1] directly (no HBM re-slice).
    return bert_encoder(x2d, add_mask, params, num_heads)   # (B, S-1, H) f32


if __name__ == "__main__":
    B, S, H, F = 2, 8, 32, 64
    NUM_HEADS, N_LAYERS, VOCAB, MAX_POS = 2, 2, 50, 64

    key = jax.random.PRNGKey(0)
    k_param, k_ids = jax.random.split(key)
    params = init_params(k_param, VOCAB, MAX_POS, H, F, N_LAYERS, NUM_HEADS)

    input_ids = jax.random.randint(k_ids, (B, S), 0, VOCAB, dtype=jnp.int32)
    attention_mask = jnp.ones((B, S), jnp.int32)

    out = plm_forward(params, input_ids, attention_mask, NUM_HEADS)
    out = jax.block_until_ready(out)
    assert out.shape == (B, S - 1, H), out.shape
    assert bool(jnp.all(jnp.isfinite(out)))
    print("KERNEL_OK")
</pallas_src>

<mosaic_0001>
module attributes {stable_mosaic.version = 11 : i64} {
  func.func @encoder_kernel(%arg0: i32, %arg1: memref<16x32xbf16, #tpu.memory_space<vmem>>, %arg2: memref<2x1x8xf32, #tpu.memory_space<vmem>>, %arg3: memref<1x32x96xbf16, #tpu.memory_space<vmem>>, %arg4: memref<1x1x96xf32, #tpu.memory_space<vmem>>, %arg5: memref<1x32x32xbf16, #tpu.memory_space<vmem>>, %arg6: memref<1x32x64xbf16, #tpu.memory_space<vmem>>, %arg7: memref<1x1x64xf32, #tpu.memory_space<vmem>>, %arg8: memref<1x64x32xbf16, #tpu.memory_space<vmem>>, %arg9: memref<1x8x32xf32, #tpu.memory_space<vmem>>, %arg10: memref<2x7x32xf32, #tpu.memory_space<vmem>>, %arg11: memref<16x32xbf16, #tpu.memory_space<vmem>>, %arg12: memref<16x32xf32, #tpu.memory_space<vmem>>) attributes {dimension_semantics = [#tpu.dimension_semantics<arbitrary>], iteration_bounds = array<i64: 2>, scalar_prefetch = 0 : i64, scratch_operands = 2 : i64, tpu.core_type = #tpu.core_type<tc>, window_params = [{pipeline_mode = #tpu.pipeline_mode<synchronous>, transform_indices = @transform_0, window_bounds = array<i64: 16, 32>}, {pipeline_mode = #tpu.pipeline_mode<synchronous>, transform_indices = @transform_1, window_bounds = array<i64: 2, 1, 8>}, {transform_indices = @transform_2, window_bounds = array<i64: 1, 32, 96>}, {transform_indices = @transform_3, window_bounds = array<i64: 1, 1, 96>}, {transform_indices = @transform_4, window_bounds = array<i64: 1, 32, 32>}, {transform_indices = @transform_5, window_bounds = array<i64: 1, 32, 64>}, {transform_indices = @transform_6, window_bounds = array<i64: 1, 1, 64>}, {transform_indices = @transform_7, window_bounds = array<i64: 1, 64, 32>}, {transform_indices = @transform_8, window_bounds = array<i64: 1, 8, 32>}, {pipeline_mode = #tpu.pipeline_mode<synchronous>, transform_indices = @transform_9, window_bounds = array<i64: 2, 7, 32>}]} {
    %c0 = arith.constant 0 : index
    %c0_0 = arith.constant 0 : index
    %c0_1 = arith.constant 0 : index
    %0 = vector.load %arg9[%c0, %c0_0, %c0_1] : memref<1x8x32xf32, #tpu.memory_space<vmem>>, vector<1x8x32xf32>
    %1 = vector.shape_cast %0 : vector<1x8x32xf32> to vector<8x32xf32>
    %2 = vector.extract_strided_slice %1 {offsets = [0, 0], sizes = [1, 32], strides = [1, 1]} : vector<8x32xf32> to vector<1x32xf32>
    %3 = vector.extract_strided_slice %1 {offsets = [1, 0], sizes = [1, 32], strides = [1, 1]} : vector<8x32xf32> to vector<1x32xf32>
    %4 = vector.extract_strided_slice %1 {offsets = [2, 0], sizes = [1, 32], strides = [1, 1]} : vector<8x32xf32> to vector<1x32xf32>
    %5 = vector.extract_strided_slice %1 {offsets = [3, 0], sizes = [1, 32], strides = [1, 1]} : vector<8x32xf32> to vector<1x32xf32>
    %6 = vector.extract_strided_slice %1 {offsets = [4, 0], sizes = [1, 32], strides = [1, 1]} : vector<8x32xf32> to vector<1x32xf32>
    %7 = vector.extract_strided_slice %1 {offsets = [5, 0], sizes = [1, 32], strides = [1, 1]} : vector<8x32xf32> to vector<1x32xf32>
    %c0_i32 = arith.constant 0 : i32
    %8 = arith.cmpi eq, %arg0, %c0_i32 : i32
    %9 = arith.extui %8 : i1 to i32
    %c0_i32_2 = arith.constant 0 : i32
    %10 = arith.cmpi ne, %9, %c0_i32_2 : i32
    scf.if %10 {
      %c0_80 = arith.constant 0 : index
      %c0_81 = arith.constant 0 : index
      %200 = vector.load %arg1[%c0_80, %c0_81] : memref<16x32xbf16, #tpu.memory_space<vmem>>, vector<16x32xbf16>
      %201 = arith.extf %200 : vector<16x32xbf16> to vector<16x32xf32>
      %202 = vector.extract_strided_slice %1 {offsets = [6, 0], sizes = [1, 32], strides = [1, 1]} : vector<8x32xf32> to vector<1x32xf32>
      %203 = vector.extract_strided_slice %1 {offsets = [7, 0], sizes = [1, 32], strides = [1, 1]} : vector<8x32xf32> to vector<1x32xf32>
      %cst_82 = arith.constant dense<0.000000e+00> : vector<16xf32>
      %204 = vector.multi_reduction <add>, %201, %cst_82 [1] : vector<16x32xf32> to vector<16xf32>
      %205 = vector.shape_cast %204 : vector<16xf32> to vector<16x1xf32>
      %cst_83 = arith.constant 3.200000e+01 : f32
      %206 = vector.broadcast %cst_83 : f32 to vector<16x1xf32>
      %207 = arith.divf %205, %206 : vector<16x1xf32>
      %208 = vector.broadcast %207 : vector<16x1xf32> to vector<16x32xf32>
      %209 = arith.subf %201, %208 : vector<16x32xf32>
      %210 = arith.mulf %209, %209 : vector<16x32xf32>
      %cst_84 = arith.constant dense<0.000000e+00> : vector<16xf32>
      %211 = vector.multi_reduction <add>, %210, %cst_84 [1] : vector<16x32xf32> to vector<16xf32>
      %212 = vector.shape_cast %211 : vector<16xf32> to vector<16x1xf32>
      %cst_85 = arith.constant 3.200000e+01 : f32
      %213 = vector.broadcast %cst_85 : f32 to vector<16x1xf32>
      %214 = arith.divf %212, %213 : vector<16x1xf32>
      %215 = vector.broadcast %207 : vector<16x1xf32> to vector<16x32xf32>
      %216 = arith.subf %201, %215 : vector<16x32xf32>
      %cst_86 = arith.constant 9.99999996E-13 : f32
      %217 = vector.broadcast %cst_86 : f32 to vector<16x1xf32>
      %218 = arith.addf %214, %217 : vector<16x1xf32>
      %219 = math.rsqrt %218 : vector<16x1xf32>
      %220 = vector.broadcast %219 : vector<16x1xf32> to vector<16x32xf32>
      %221 = arith.mulf %216, %220 : vector<16x32xf32>
      %222 = vector.broadcast %202 : vector<1x32xf32> to vector<16x32xf32>
      %223 = arith.mulf %221, %222 : vector<16x32xf32>
      %224 = vector.broadcast %203 : vector<1x32xf32> to vector<16x32xf32>
      %225 = arith.addf %223, %224 : vector<16x32xf32>
      %226 = arith.truncf %225 : vector<16x32xf32> to vector<16x32xbf16>
      %c0_87 = arith.constant 0 : index
      %c0_88 = arith.constant 0 : index
      %227 = vector.load %arg11[%c0_87, %c0_88] : memref<16x32xbf16, #tpu.memory_space<vmem>>, vector<16x32xbf16>
      tpu.vector_store %arg11[%c0_87, %c0_88], %226 {strides = array<i32>} : memref<16x32xbf16, #tpu.memory_space<vmem>>, vector<16x32xbf16>,
    } else {
    }
    %c0_3 = arith.constant 0 : index
    %c0_4 = arith.constant 0 : index
    %11 = vector.load %arg11[%c0_3, %c0_4] : memref<16x32xbf16, #tpu.memory_space<vmem>>, vector<16x32xbf16>
    %12 = arith.extf %11 : vector<16x32xbf16> to vector<16x32xf32>
    %c0_5 = arith.constant 0 : index
    %c0_6 = arith.constant 0 : index
    %c0_7 = arith.constant 0 : index
    %13 = vector.load %arg3[%c0_5, %c0_6, %c0_7] : memref<1x32x96xbf16, #tpu.memory_space<vmem>>, vector<1x32x96xbf16>
    %14 = vector.shape_cast %13 : vector<1x32x96xbf16> to vector<32x96xbf16>
    %cst = arith.constant dense<0.000000e+00> : vector<16x96xf32>
    %15 = tpu.matmul %11, %14, %cst {dimension_numbers = #tpu.dot_dimension_numbers<[1], [0], [0], [1], [0, 0, 1, 1], [], []>} : vector<16x32xbf16>, vector<32x96xbf16>, vector<16x96xf32> -> vector<16x96xf32>
    %c0_8 = arith.constant 0 : index
    %c0_9 = arith.constant 0 : index
    %c0_10 = arith.constant 0 : index
    %16 = vector.load %arg4[%c0_8, %c0_9, %c0_10] : memref<1x1x96xf32, #tpu.memory_space<vmem>>, vector<1x1x96xf32>
    %17 = vector.shape_cast %16 : vector<1x1x96xf32> to vector<1x96xf32>
    %18 = vector.broadcast %17 : vector<1x96xf32> to vector<16x96xf32>
    %19 = arith.addf %15, %18 : vector<16x96xf32>
    %20 = arith.truncf %19 : vector<16x96xf32> to vector<16x96xbf16>
    %21 = vector.extract_strided_slice %20 {offsets = [0, 0], sizes = [8, 96], strides = [1, 1]} : vector<16x96xbf16> to vector<8x96xbf16>
    %c0_11 = arith.constant 0 : index
    %c0_12 = arith.constant 0 : index
    %c0_13 = arith.constant 0 : index
    %22 = vector.load %arg2[%c0_11, %c0_12, %c0_13] : memref<2x1x8xf32, #tpu.memory_space<vmem>>, vector<1x1x8xf32>
    %23 = vector.shape_cast %22 : vector<1x1x8xf32> to vector<1x8xf32>
    %24 = vector.extract_strided_slice %21 {offsets = [0, 0], sizes = [8, 16], strides = [1, 1]} : vector<8x96xbf16> to vector<8x16xbf16>
    %25 = vector.extract_strided_slice %21 {offsets = [0, 32], sizes = [8, 16], strides = [1, 1]} : vector<8x96xbf16> to vector<8x16xbf16>
    %26 = vector.extract_strided_slice %21 {offsets = [0, 64], sizes = [8, 16], strides = [1, 1]} : vector<8x96xbf16> to vector<8x16xbf16>
    %cst_14 = arith.constant dense<0.000000e+00> : vector<8x8xf32>
    %27 = tpu.matmul %24, %25, %cst_14 {dimension_numbers = #tpu.dot_dimension_numbers<[1], [1], [0], [0], [0, 0, 1, 0], [], []>} : vector<8x16xbf16>, vector<8x16xbf16>, vector<8x8xf32> -> vector<8x8xf32>
    %28 = vector.broadcast %23 : vector<1x8xf32> to vector<8x8xf32>
    %29 = arith.addf %27, %28 : vector<8x8xf32>
    %cst_15 = arith.constant dense<0xFF800000> : vector<8xf32>
    %30 = vector.multi_reduction <maximumf>, %29, %cst_15 [1] : vector<8x8xf32> to vector<8xf32>
    %31 = vector.shape_cast %30 : vector<8xf32> to vector<8x1xf32>
    %32 = vector.broadcast %31 : vector<8x1xf32> to vector<8x8xf32>
    %33 = arith.subf %29, %32 : vector<8x8xf32>
    %34 = math.exp %33 : vector<8x8xf32>
    %cst_16 = arith.constant dense<0.000000e+00> : vector<8xf32>
    %35 = vector.multi_reduction <add>, %34, %cst_16 [1] : vector<8x8xf32> to vector<8xf32>
    %36 = vector.shape_cast %35 : vector<8xf32> to vector<8x1xf32>
    %37 = tpu.reciprocal %36 {approx = true} : vector<8x1xf32> -> vector<8x1xf32>
    %38 = vector.broadcast %37 : vector<8x1xf32> to vector<8x8xf32>
    %39 = arith.mulf %34, %38 : vector<8x8xf32>
    %40 = arith.truncf %39 : vector<8x8xf32> to vector<8x8xbf16>
    %cst_17 = arith.constant dense<0.000000e+00> : vector<8x16xf32>
    %41 = tpu.matmul %40, %26, %cst_17 {dimension_numbers = #tpu.dot_dimension_numbers<[1], [0], [0], [1], [0, 0, 1, 1], [], []>} : vector<8x8xbf16>, vector<8x16xbf16>, vector<8x16xf32> -> vector<8x16xf32>
    %42 = arith.truncf %41 : vector<8x16xf32> to vector<8x16xbf16>
    %c0_18 = arith.constant 0 : index
    %c0_19 = arith.constant 0 : index
    %c0_20 = arith.constant 0 : index
    %43 = vector.load %arg5[%c0_18, %c0_19, %c0_20] : memref<1x32x32xbf16, #tpu.memory_space<vmem>>, vector<1x16x32xbf16>
    %44 = vector.shape_cast %43 : vector<1x16x32xbf16> to vector<16x32xbf16>
    %cst_21 = arith.constant dense<0.000000e+00> : vector<8x32xf32>
    %45 = tpu.matmul %42, %44, %cst_21 {dimension_numbers = #tpu.dot_dimension_numbers<[1], [0], [0], [1], [0, 0, 1, 1], [], []>} : vector<8x16xbf16>, vector<16x32xbf16>, vector<8x32xf32> -> vector<8x32xf32>
    %46 = vector.extract_strided_slice %21 {offsets = [0, 16], sizes = [8, 16], strides = [1, 1]} : vector<8x96xbf16> to vector<8x16xbf16>
    %47 = vector.extract_strided_slice %21 {offsets = [0, 48], sizes = [8, 16], strides = [1, 1]} : vector<8x96xbf16> to vector<8x16xbf16>
    %48 = vector.extract_strided_slice %21 {offsets = [0, 80], sizes = [8, 16], strides = [1, 1]} : vector<8x96xbf16> to vector<8x16xbf16>
    %cst_22 = arith.constant dense<0.000000e+00> : vector<8x8xf32>
    %49 = tpu.matmul %46, %47, %cst_22 {dimension_numbers = #tpu.dot_dimension_numbers<[1], [1], [0], [0], [0, 0, 1, 0], [], []>} : vector<8x16xbf16>, vector<8x16xbf16>, vector<8x8xf32> -> vector<8x8xf32>
    %50 = vector.broadcast %23 : vector<1x8xf32> to vector<8x8xf32>
    %51 = arith.addf %49, %50 : vector<8x8xf32>
    %cst_23 = arith.constant dense<0xFF800000> : vector<8xf32>
    %52 = vector.multi_reduction <maximumf>, %51, %cst_23 [1] : vector<8x8xf32> to vector<8xf32>
    %53 = vector.shape_cast %52 : vector<8xf32> to vector<8x1xf32>
    %54 = vector.broadcast %53 : vector<8x1xf32> to vector<8x8xf32>
    %55 = arith.subf %51, %54 : vector<8x8xf32>
    %56 = math.exp %55 : vector<8x8xf32>
    %cst_24 = arith.constant dense<0.000000e+00> : vector<8xf32>
    %57 = vector.multi_reduction <add>, %56, %cst_24 [1] : vector<8x8xf32> to vector<8xf32>
    %58 = vector.shape_cast %57 : vector<8xf32> to vector<8x1xf32>
    %59 = tpu.reciprocal %58 {approx = true} : vector<8x1xf32> -> vector<8x1xf32>
    %60 = vector.broadcast %59 : vector<8x1xf32> to vector<8x8xf32>
    %61 = arith.mulf %56, %60 : vector<8x8xf32>
    %62 = arith.truncf %61 : vector<8x8xf32> to vector<8x8xbf16>
    %cst_25 = arith.constant dense<0.000000e+00> : vector<8x16xf32>
    %63 = tpu.matmul %62, %48, %cst_25 {dimension_numbers = #tpu.dot_dimension_numbers<[1], [0], [0], [1], [0, 0, 1, 1], [], []>} : vector<8x8xbf16>, vector<8x16xbf16>, vector<8x16xf32> -> vector<8x16xf32>
    %64 = arith.truncf %63 : vector<8x16xf32> to vector<8x16xbf16>
    %c0_26 = arith.constant 0 : index
    %c16 = arith.constant 16 : index
    %c0_27 = arith.constant 0 : index
    %65 = vector.load %arg5[%c0_26, %c16, %c0_27] : memref<1x32x32xbf16, #tpu.memory_space<vmem>>, vector<1x16x32xbf16>
    %66 = vector.shape_cast %65 : vector<1x16x32xbf16> to vector<16x32xbf16>
    %cst_28 = arith.constant dense<0.000000e+00> : vector<8x32xf32>
    %67 = tpu.matmul %64, %66, %cst_28 {dimension_numbers = #tpu.dot_dimension_numbers<[1], [0], [0], [1], [0, 0, 1, 1], [], []>} : vector<8x16xbf16>, vector<16x32xbf16>, vector<8x32xf32> -> vector<8x32xf32>
    %68 = arith.addf %45, %67 : vector<8x32xf32>
    %c0_29 = arith.constant 0 : index
    %c0_30 = arith.constant 0 : index
    %69 = vector.load %arg12[%c0_29, %c0_30] : memref<16x32xf32, #tpu.memory_space<vmem>>, vector<8x32xf32>
    tpu.vector_store %arg12[%c0_29, %c0_30], %68 {strides = array<i32>} : memref<16x32xf32, #tpu.memory_space<vmem>>, vector<8x32xf32>,
    %70 = vector.extract_strided_slice %20 {offsets = [8, 0], sizes = [8, 96], strides = [1, 1]} : vector<16x96xbf16> to vector<8x96xbf16>
    %c1 = arith.constant 1 : index
    %c0_31 = arith.constant 0 : index
    %c0_32 = arith.constant 0 : index
    %71 = vector.load %arg2[%c1, %c0_31, %c0_32] : memref<2x1x8xf32, #tpu.memory_space<vmem>>, vector<1x1x8xf32>
    %72 = vector.shape_cast %71 : vector<1x1x8xf32> to vector<1x8xf32>
    %73 = vector.extract_strided_slice %70 {offsets = [0, 0], sizes = [8, 16], strides = [1, 1]} : vector<8x96xbf16> to vector<8x16xbf16>
    %74 = vector.extract_strided_slice %70 {offsets = [0, 32], sizes = [8, 16], strides = [1, 1]} : vector<8x96xbf16> to vector<8x16xbf16>
    %75 = vector.extract_strided_slice %70 {offsets = [0, 64], sizes = [8, 16], strides = [1, 1]} : vector<8x96xbf16> to vector<8x16xbf16>
    %cst_33 = arith.constant dense<0.000000e+00> : vector<8x8xf32>
    %76 = tpu.matmul %73, %74, %cst_33 {dimension_numbers = #tpu.dot_dimension_numbers<[1], [1], [0], [0], [0, 0, 1, 0], [], []>} : vector<8x16xbf16>, vector<8x16xbf16>, vector<8x8xf32> -> vector<8x8xf32>
    %77 = vector.broadcast %72 : vector<1x8xf32> to vector<8x8xf32>
    %78 = arith.addf %76, %77 : vector<8x8xf32>
    %cst_34 = arith.constant dense<0xFF800000> : vector<8xf32>
    %79 = vector.multi_reduction <maximumf>, %78, %cst_34 [1] : vector<8x8xf32> to vector<8xf32>
    %80 = vector.shape_cast %79 : vector<8xf32> to vector<8x1xf32>
    %81 = vector.broadcast %80 : vector<8x1xf32> to vector<8x8xf32>
    %82 = arith.subf %78, %81 : vector<8x8xf32>
    %83 = math.exp %82 : vector<8x8xf32>
    %cst_35 = arith.constant dense<0.000000e+00> : vector<8xf32>
    %84 = vector.multi_reduction <add>, %83, %cst_35 [1] : vector<8x8xf32> to vector<8xf32>
    %85 = vector.shape_cast %84 : vector<8xf32> to vector<8x1xf32>
    %86 = tpu.reciprocal %85 {approx = true} : vector<8x1xf32> -> vector<8x1xf32>
    %87 = vector.broadcast %86 : vector<8x1xf32> to vector<8x8xf32>
    %88 = arith.mulf %83, %87 : vector<8x8xf32>
    %89 = arith.truncf %88 : vector<8x8xf32> to vector<8x8xbf16>
    %cst_36 = arith.constant dense<0.000000e+00> : vector<8x16xf32>
    %90 = tpu.matmul %89, %75, %cst_36 {dimension_numbers = #tpu.dot_dimension_numbers<[1], [0], [0], [1], [0, 0, 1, 1], [], []>} : vector<8x8xbf16>, vector<8x16xbf16>, vector<8x16xf32> -> vector<8x16xf32>
    %91 = arith.truncf %90 : vector<8x16xf32> to vector<8x16xbf16>
    %c0_37 = arith.constant 0 : index
    %c0_38 = arith.constant 0 : index
    %c0_39 = arith.constant 0 : index
    %92 = vector.load %arg5[%c0_37, %c0_38, %c0_39] : memref<1x32x32xbf16, #tpu.memory_space<vmem>>, vector<1x16x32xbf16>
    %93 = vector.shape_cast %92 : vector<1x16x32xbf16> to vector<16x32xbf16>
    %cst_40 = arith.constant dense<0.000000e+00> : vector<8x32xf32>
    %94 = tpu.matmul %91, %93, %cst_40 {dimension_numbers = #tpu.dot_dimension_numbers<[1], [0], [0], [1], [0, 0, 1, 1], [], []>} : vector<8x16xbf16>, vector<16x32xbf16>, vector<8x32xf32> -> vector<8x32xf32>
    %95 = vector.extract_strided_slice %70 {offsets = [0, 16], sizes = [8, 16], strides = [1, 1]} : vector<8x96xbf16> to vector<8x16xbf16>
    %96 = vector.extract_strided_slice %70 {offsets = [0, 48], sizes = [8, 16], strides = [1, 1]} : vector<8x96xbf16> to vector<8x16xbf16>
    %97 = vector.extract_strided_slice %70 {offsets = [0, 80], sizes = [8, 16], strides = [1, 1]} : vector<8x96xbf16> to vector<8x16xbf16>
    %cst_41 = arith.constant dense<0.000000e+00> : vector<8x8xf32>
    %98 = tpu.matmul %95, %96, %cst_41 {dimension_numbers = #tpu.dot_dimension_numbers<[1], [1], [0], [0], [0, 0, 1, 0], [], []>} : vector<8x16xbf16>, vector<8x16xbf16>, vector<8x8xf32> -> vector<8x8xf32>
    %99 = vector.broadcast %72 : vector<1x8xf32> to vector<8x8xf32>
    %100 = arith.addf %98, %99 : vector<8x8xf32>
    %cst_42 = arith.constant dense<0xFF800000> : vector<8xf32>
    %101 = vector.multi_reduction <maximumf>, %100, %cst_42 [1] : vector<8x8xf32> to vector<8xf32>
    %102 = vector.shape_cast %101 : vector<8xf32> to vector<8x1xf32>
    %103 = vector.broadcast %102 : vector<8x1xf32> to vector<8x8xf32>
    %104 = arith.subf %100, %103 : vector<8x8xf32>
    %105 = math.exp %104 : vector<8x8xf32>
    %cst_43 = arith.constant dense<0.000000e+00> : vector<8xf32>
    %106 = vector.multi_reduction <add>, %105, %cst_43 [1] : vector<8x8xf32> to vector<8xf32>
    %107 = vector.shape_cast %106 : vector<8xf32> to vector<8x1xf32>
    %108 = tpu.reciprocal %107 {approx = true} : vector<8x1xf32> -> vector<8x1xf32>
    %109 = vector.broadcast %108 : vector<8x1xf32> to vector<8x8xf32>
    %110 = arith.mulf %105, %109 : vector<8x8xf32>
    %111 = arith.truncf %110 : vector<8x8xf32> to vector<8x8xbf16>
    %cst_44 = arith.constant dense<0.000000e+00> : vector<8x16xf32>
    %112 = tpu.matmul %111, %97, %cst_44 {dimension_numbers = #tpu.dot_dimension_numbers<[1], [0], [0], [1], [0, 0, 1, 1], [], []>} : vector<8x8xbf16>, vector<8x16xbf16>, vector<8x16xf32> -> vector<8x16xf32>
    %113 = arith.truncf %112 : vector<8x16xf32> to vector<8x16xbf16>
    %c0_45 = arith.constant 0 : index
    %c16_46 = arith.constant 16 : index
    %c0_47 = arith.constant 0 : index
    %114 = vector.load %arg5[%c0_45, %c16_46, %c0_47] : memref<1x32x32xbf16, #tpu.memory_space<vmem>>, vector<1x16x32xbf16>
    %115 = vector.shape_cast %114 : vector<1x16x32xbf16> to vector<16x32xbf16>
    %cst_48 = arith.constant dense<0.000000e+00> : vector<8x32xf32>
    %116 = tpu.matmul %113, %115, %cst_48 {dimension_numbers = #tpu.dot_dimension_numbers<[1], [0], [0], [1], [0, 0, 1, 1], [], []>} : vector<8x16xbf16>, vector<16x32xbf16>, vector<8x32xf32> -> vector<8x32xf32>
    %117 = arith.addf %94, %116 : vector<8x32xf32>
    %c8 = arith.constant 8 : index
    %c0_49 = arith.constant 0 : index
    %118 = vector.load %arg12[%c8, %c0_49] : memref<16x32xf32, #tpu.memory_space<vmem>>, vector<8x32xf32>
    tpu.vector_store %arg12[%c8, %c0_49], %117 {strides = array<i32>} : memref<16x32xf32, #tpu.memory_space<vmem>>, vector<8x32xf32>,
    %c0_50 = arith.constant 0 : index
    %c0_51 = arith.constant 0 : index
    %119 = vector.load %arg12[%c0_50, %c0_51] : memref<16x32xf32, #tpu.memory_space<vmem>>, vector<16x32xf32>
    %120 = arith.addf %12, %119 : vector<16x32xf32>
    %121 = vector.broadcast %2 : vector<1x32xf32> to vector<16x32xf32>
    %122 = arith.addf %120, %121 : vector<16x32xf32>
    %cst_52 = arith.constant dense<0.000000e+00> : vector<16xf32>
    %123 = vector.multi_reduction <add>, %122, %cst_52 [1] : vector<16x32xf32> to vector<16xf32>
    %124 = vector.shape_cast %123 : vector<16xf32> to vector<16x1xf32>
    %cst_53 = arith.constant 3.200000e+01 : f32
    %125 = vector.broadcast %cst_53 : f32 to vector<16x1xf32>
    %126 = arith.divf %124, %125 : vector<16x1xf32>
    %127 = vector.broadcast %126 : vector<16x1xf32> to vector<16x32xf32>
    %128 = arith.subf %122, %127 : vector<16x32xf32>
    %129 = arith.mulf %128, %128 : vector<16x32xf32>
    %cst_54 = arith.constant dense<0.000000e+00> : vector<16xf32>
    %130 = vector.multi_reduction <add>, %129, %cst_54 [1] : vector<16x32xf32> to vector<16xf32>
    %131 = vector.shape_cast %130 : vector<16xf32> to vector<16x1xf32>
    %cst_55 = arith.constant 3.200000e+01 : f32
    %132 = vector.broadcast %cst_55 : f32 to vector<16x1xf32>
    %133 = arith.divf %131, %132 : vector<16x1xf32>
    %134 = vector.broadcast %126 : vector<16x1xf32> to vector<16x32xf32>
    %135 = arith.subf %122, %134 : vector<16x32xf32>
    %cst_56 = arith.constant 9.99999996E-13 : f32
    %136 = vector.broadcast %cst_56 : f32 to vector<16x1xf32>
    %137 = arith.addf %133, %136 : vector<16x1xf32>
    %138 = math.rsqrt %137 : vector<16x1xf32>
    %139 = vector.broadcast %138 : vector<16x1xf32> to vector<16x32xf32>
    %140 = arith.mulf %135, %139 : vector<16x32xf32>
    %141 = vector.broadcast %3 : vector<1x32xf32> to vector<16x32xf32>
    %142 = arith.mulf %140, %141 : vector<16x32xf32>
    %143 = vector.broadcast %4 : vector<1x32xf32> to vector<16x32xf32>
    %144 = arith.addf %142, %143 : vector<16x32xf32>
    %145 = arith.truncf %144 : vector<16x32xf32> to vector<16x32xbf16>
    %c0_57 = arith.constant 0 : index
    %c0_58 = arith.constant 0 : index
    %c0_59 = arith.constant 0 : index
    %146 = vector.load %arg6[%c0_57, %c0_58, %c0_59] : memref<1x32x64xbf16, #tpu.memory_space<vmem>>, vector<1x32x64xbf16>
    %147 = vector.shape_cast %146 : vector<1x32x64xbf16> to vector<32x64xbf16>
    %cst_60 = arith.constant dense<0.000000e+00> : vector<16x64xf32>
    %148 = tpu.matmul %145, %147, %cst_60 {dimension_numbers = #tpu.dot_dimension_numbers<[1], [0], [0], [1], [0, 0, 1, 1], [], []>} : vector<16x32xbf16>, vector<32x64xbf16>, vector<16x64xf32> -> vector<16x64xf32>
    %c0_61 = arith.constant 0 : index
    %c0_62 = arith.constant 0 : index
    %c0_63 = arith.constant 0 : index
    %149 = vector.load %arg7[%c0_61, %c0_62, %c0_63] : memref<1x1x64xf32, #tpu.memory_space<vmem>>, vector<1x1x64xf32>
    %150 = vector.shape_cast %149 : vector<1x1x64xf32> to vector<1x64xf32>
    %151 = vector.broadcast %150 : vector<1x64xf32> to vector<16x64xf32>
    %152 = arith.addf %148, %151 : vector<16x64xf32>
    %153 = arith.mulf %152, %152 : vector<16x64xf32>
    %154 = arith.mulf %152, %153 : vector<16x64xf32>
    %cst_64 = arith.constant 4.471500e-02 : f32
    %155 = vector.broadcast %cst_64 : f32 to vector<16x64xf32>
    %156 = arith.mulf %155, %154 : vector<16x64xf32>
    %157 = arith.addf %152, %156 : vector<16x64xf32>
    %cst_65 = arith.constant 0.797884583 : f32
    %158 = vector.broadcast %cst_65 : f32 to vector<16x64xf32>
    %159 = arith.mulf %158, %157 : vector<16x64xf32>
    %160 = math.tanh %159 : vector<16x64xf32>
    %cst_66 = arith.constant 1.000000e+00 : f32
    %161 = vector.broadcast %cst_66 : f32 to vector<16x64xf32>
    %162 = arith.addf %161, %160 : vector<16x64xf32>
    %cst_67 = arith.constant 5.000000e-01 : f32
    %163 = vector.broadcast %cst_67 : f32 to vector<16x64xf32>
    %164 = arith.mulf %163, %162 : vector<16x64xf32>
    %165 = arith.mulf %152, %164 : vector<16x64xf32>
    %166 = arith.truncf %165 : vector<16x64xf32> to vector<16x64xbf16>
    %c0_68 = arith.constant 0 : index
    %c0_69 = arith.constant 0 : index
    %c0_70 = arith.constant 0 : index
    %167 = vector.load %arg8[%c0_68, %c0_69, %c0_70] : memref<1x64x32xbf16, #tpu.memory_space<vmem>>, vector<1x64x32xbf16>
    %168 = vector.shape_cast %167 : vector<1x64x32xbf16> to vector<64x32xbf16>
    %cst_71 = arith.constant dense<0.000000e+00> : vector<16x32xf32>
    %169 = tpu.matmul %166, %168, %cst_71 {dimension_numbers = #tpu.dot_dimension_numbers<[1], [0], [0], [1], [0, 0, 1, 1], [], []>} : vector<16x64xbf16>, vector<64x32xbf16>, vector<16x32xf32> -> vector<16x32xf32>
    %170 = vector.broadcast %5 : vector<1x32xf32> to vector<16x32xf32>
    %171 = arith.addf %169, %170 : vector<16x32xf32>
    %172 = arith.addf %144, %171 : vector<16x32xf32>
    %cst_72 = arith.constant dense<0.000000e+00> : vector<16xf32>
    %173 = vector.multi_reduction <add>, %172, %cst_72 [1] : vector<16x32xf32> to vector<16xf32>
    %174 = vector.shape_cast %173 : vector<16xf32> to vector<16x1xf32>
    %cst_73 = arith.constant 3.200000e+01 : f32
    %175 = vector.broadcast %cst_73 : f32 to vector<16x1xf32>
    %176 = arith.divf %174, %175 : vector<16x1xf32>
    %177 = vector.broadcast %176 : vector<16x1xf32> to vector<16x32xf32>
    %178 = arith.subf %172, %177 : vector<16x32xf32>
    %179 = arith.mulf %178, %178 : vector<16x32xf32>
    %cst_74 = arith.constant dense<0.000000e+00> : vector<16xf32>
    %180 = vector.multi_reduction <add>, %179, %cst_74 [1] : vector<16x32xf32> to vector<16xf32>
    %181 = vector.shape_cast %180 : vector<16xf32> to vector<16x1xf32>
    %cst_75 = arith.constant 3.200000e+01 : f32
    %182 = vector.broadcast %cst_75 : f32 to vector<16x1xf32>
    %183 = arith.divf %181, %182 : vector<16x1xf32>
    %184 = vector.broadcast %176 : vector<16x1xf32> to vector<16x32xf32>
    %185 = arith.subf %172, %184 : vector<16x32xf32>
    %cst_76 = arith.constant 9.99999996E-13 : f32
    %186 = vector.broadcast %cst_76 : f32 to vector<16x1xf32>
    %187 = arith.addf %183, %186 : vector<16x1xf32>
    %188 = math.rsqrt %187 : vector<16x1xf32>
    %189 = vector.broadcast %188 : vector<16x1xf32> to vector<16x32xf32>
    %190 = arith.mulf %185, %189 : vector<16x32xf32>
    %191 = vector.broadcast %6 : vector<1x32xf32> to vector<16x32xf32>
    %192 = arith.mulf %190, %191 : vector<16x32xf32>
    %193 = vector.broadcast %7 : vector<1x32xf32> to vector<16x32xf32>
    %194 = arith.addf %192, %193 : vector<16x32xf32>
    %195 = arith.truncf %194 : vector<16x32xf32> to vector<16x32xbf16>
    %c0_77 = arith.constant 0 : index
    %c0_78 = arith.constant 0 : index
    %196 = vector.load %arg11[%c0_77, %c0_78] : memref<16x32xbf16, #tpu.memory_space<vmem>>, vector<16x32xbf16>
    tpu.vector_store %arg11[%c0_77, %c0_78], %195 {strides = array<i32>} : memref<16x32xbf16, #tpu.memory_space<vmem>>, vector<16x32xbf16>,
    %c1_i32 = arith.constant 1 : i32
    %197 = arith.cmpi eq, %arg0, %c1_i32 : i32
    %198 = arith.extui %197 : i1 to i32
    %c0_i32_79 = arith.constant 0 : i32
    %199 = arith.cmpi ne, %198, %c0_i32_79 : i32
    scf.if %199 {
      %200 = vector.extract_strided_slice %194 {offsets = [0, 0], sizes = [7, 32], strides = [1, 1]} : vector<16x32xf32> to vector<7x32xf32>
      %c0_80 = arith.constant 0 : index
      %c0_81 = arith.constant 0 : index
      %c0_82 = arith.constant 0 : index
      %201 = vector.load %arg10[%c0_80, %c0_81, %c0_82] : memref<2x7x32xf32, #tpu.memory_space<vmem>>, vector<1x7x32xf32>
      %202 = vector.shape_cast %201 : vector<1x7x32xf32> to vector<7x32xf32>
      %203 = vector.shape_cast %200 : vector<7x32xf32> to vector<1x7x32xf32>
      tpu.vector_store %arg10[%c0_80, %c0_81, %c0_82], %203 {strides = array<i32>} : memref<2x7x32xf32, #tpu.memory_space<vmem>>, vector<1x7x32xf32>,
      %204 = vector.extract_strided_slice %194 {offsets = [8, 0], sizes = [7, 32], strides = [1, 1]} : vector<16x32xf32> to vector<7x32xf32>
      %c1_83 = arith.constant 1 : index
      %c0_84 = arith.constant 0 : index
      %c0_85 = arith.constant 0 : index
      %205 = vector.load %arg10[%c1_83, %c0_84, %c0_85] : memref<2x7x32xf32, #tpu.memory_space<vmem>>, vector<1x7x32xf32>
      %206 = vector.shape_cast %205 : vector<1x7x32xf32> to vector<7x32xf32>
      %207 = vector.shape_cast %204 : vector<7x32xf32> to vector<1x7x32xf32>
      tpu.vector_store %arg10[%c1_83, %c0_84, %c0_85], %207 {strides = array<i32>} : memref<2x7x32xf32, #tpu.memory_space<vmem>>, vector<1x7x32xf32>,
    } else {
    }
    return
  }
  func.func @transform_0(%arg0: i32) -> (i32, i32) {
    %c0_i32 = arith.constant 0 : i32
    %c0_i32_0 = arith.constant 0 : i32
    %c0_i32_1 = arith.constant 0 : i32
    return %c0_i32, %c0_i32_0 : i32, i32
  }
  func.func @transform_1(%arg0: i32) -> (i32, i32, i32) {
    %c0_i32 = arith.constant 0 : i32
    %c0_i32_0 = arith.constant 0 : i32
    %c0_i32_1 = arith.constant 0 : i32
    %c0_i32_2 = arith.constant 0 : i32
    return %c0_i32, %c0_i32_0, %c0_i32_1 : i32, i32, i32
  }
  func.func @transform_2(%arg0: i32) -> (i32, i32, i32) {
    %c0_i32 = arith.constant 0 : i32
    %c0_i32_0 = arith.constant 0 : i32
    %c0_i32_1 = arith.constant 0 : i32
    return %arg0, %c0_i32, %c0_i32_0 : i32, i32, i32
  }
  func.func @transform_3(%arg0: i32) -> (i32, i32, i32) {
    %c0_i32 = arith.constant 0 : i32
    %c0_i32_0 = arith.constant 0 : i32
    %c0_i32_1 = arith.constant 0 : i32
    return %arg0, %c0_i32, %c0_i32_0 : i32, i32, i32
  }
  func.func @transform_4(%arg0: i32) -> (i32, i32, i32) {
    %c0_i32 = arith.constant 0 : i32
    %c0_i32_0 = arith.constant 0 : i32
    %c0_i32_1 = arith.constant 0 : i32
    return %arg0, %c0_i32, %c0_i32_0 : i32, i32, i32
  }
  func.func @transform_5(%arg0: i32) -> (i32, i32, i32) {
    %c0_i32 = arith.constant 0 : i32
    %c0_i32_0 = arith.constant 0 : i32
    %c0_i32_1 = arith.constant 0 : i32
    return %arg0, %c0_i32, %c0_i32_0 : i32, i32, i32
  }
  func.func @transform_6(%arg0: i32) -> (i32, i32, i32) {
    %c0_i32 = arith.constant 0 : i32
    %c0_i32_0 = arith.constant 0 : i32
    %c0_i32_1 = arith.constant 0 : i32
    return %arg0, %c0_i32, %c0_i32_0 : i32, i32, i32
  }
  func.func @transform_7(%arg0: i32) -> (i32, i32, i32) {
    %c0_i32 = arith.constant 0 : i32
    %c0_i32_0 = arith.constant 0 : i32
    %c0_i32_1 = arith.constant 0 : i32
    return %arg0, %c0_i32, %c0_i32_0 : i32, i32, i32
  }
  func.func @transform_8(%arg0: i32) -> (i32, i32, i32) {
    %c0_i32 = arith.constant 0 : i32
    %c0_i32_0 = arith.constant 0 : i32
    %c0_i32_1 = arith.constant 0 : i32
    return %arg0, %c0_i32, %c0_i32_0 : i32, i32, i32
  }
  func.func @transform_9(%arg0: i32) -> (i32, i32, i32) {
    %c0_i32 = arith.constant 0 : i32
    %c0_i32_0 = arith.constant 0 : i32
    %c0_i32_1 = arith.constant 0 : i32
    %c0_i32_2 = arith.constant 0 : i32
    return %c0_i32, %c0_i32_0, %c0_i32_1 : i32, i32, i32
  }
}

</mosaic_0001>

<bundles_post_ra>
// kernel: tpu_custom_call.1
= control target key start
LH: loop header
LB: loop body
LE: loop exit
PB: predicated region body
PF: predicated region fallthrough
CT: control target
= control target key end

     0   :  { %s2448_s0 = inlined_call_operand.hbm [shape: bf16[16,32], index: 0, kind: input, shape index: {}]   ;;  %s2449_s1 = inlined_call_operand.vmem [shape: f32[2,1,8], index: 1, kind: input, shape index: {}]   ;;  %s2450_s2 = inlined_call_operand.vmem [shape: bf16[2,32,96], index: 2, kind: input, shape index: {}]   ;;  %s2451_s3 = inlined_call_operand.hbm [shape: f32[2,1,96], index: 3, kind: input, shape index: {}]   ;;  %s2452_s4 = inlined_call_operand.vmem [shape: bf16[2,32,32], index: 4, kind: input, shape index: {}]   ;;  %s2453_s5 = inlined_call_operand.vmem [shape: bf16[2,32,64], index: 5, kind: input, shape index: {}]   ;;  %s2454_s6 = inlined_call_operand.vmem [shape: f32[2,1,64], index: 6, kind: input, shape index: {}]   ;;  %s2455_s7 = inlined_call_operand.vmem [shape: bf16[2,64,32], index: 7, kind: input, shape index: {}]   ;;  %s2456_s8 = inlined_call_operand.vmem [shape: f32[2,8,32], index: 8, kind: input, shape index: {}]   ;;  %s2457_s9 = inlined_call_operand.vmem [shape: f32[2,7,32], index: 9, kind: output, shape index: {}]  }
   0x1   :  { %2464 = sst [smem:[#allocation11_spill]] %s2457_s9 }
   0x2   :  { %14 = vsyncpa [#allocation5], 0 }
   0x3   :  { %15 = vsyncpa [#allocation7], 0 }
   0x4   :  { %17 = vsyncpa [#allocation7 + $0x1], 0  ;;  %s2098_s30 = smov 0   ;;  %s2100_s10 = smov 0  }
   0x5   :  { %s2102_s11 = smov 0   ;;  %s2104_s12 = smov 0  }
   0x6 LB: > { %s2117_s13 = sadd.s32 4294967295, %s2035_s12   ;;  %p111_p0 = scmp.ne.s32.totalorder %s2027_s10, %s2023_s30  ;;  %s2035_s12 = sphi %s2104_s12, %s2477_s12   ;;  %s2031_s11 = sphi %s2102_s11, %s2480_s11   ;;  %s2027_s10 = sphi %s2100_s10, %s2479_s10   ;;  %s2023_s30 = sphi %s2098_s30, %s2478_s30  }
   0x7   : > { %p2458_p1 = scmp.eq.s32.totalorder %s2117_s13, 0  ;;  %p1633_p2 = scmp.ge.s32.totalorder %s2035_s12, 1 }
   0x8   : > { %p273_p3 = scmp.lt.s32.totalorder %s2035_s12, 3  ;;  %s2037_s16 = smov [#allocation4]  }
   0x9   : > { %p2126_p5 = por %p2458_p1, %p111_p0  ;;  %s285_s17 = sshll.u32 %s2037_s16, 4  ;;  %s286_s17 = int_to_ptr.vmem [resolvable:$true] %s285_s17 }
   0xa   : > { %p2130_p6 = pnand %p1633_p2, %p273_p3  ;;  %s2143_s19 = sadd.s32 1, %s2035_s12  }
   0xb   : > { %s2465_s14 = scalar_select %p2126_p5, 1, 0 }
   0xc   : > { %s2466_s15 = scalar_select %p2130_p6, 1, 0 }
   0xd   : > { %p1842_p7 = pneg %p2130_p6  ;;  %2468 = sst [smem:[#allocation10_spill]] %s2143_s19 }
   0xe   : > { %s98_s20 = sadd.s32 1, %s2031_s11  ;;  %s95_s21 = ssub.s32 %s2035_s12, %s2143_s19 }
   0xf   : > { %p2138_p8 = pnand %p1842_p7, %p2458_p1  ;;  %s1939_s24 = scalar_lea.hbm %s2448_s0, 128 }
  0x10   : > { %p1940_p9 = scmp.ne.s32.totalorder %s2448_s0, %s1939_s24  ;;  %p1946_p13 = scmp.lt.u32.totalorder %s1939_s24, %s2448_s0 }
  0x11   : > { %p1941_p10 = pneg %p2138_p8 }
  0x13   : > { %p1942_p11 = pnand %p1941_p10, %p1940_p9 }
  0x15   : > { %p1943_p12 = pneg %p1942_p11 }
  0x17   : > { %p1948_p0 = pnand %p1946_p13, %p1943_p12 }
  0x19   : > { %1951 = shalt.err (!%p1948_p0)
}
  0x1a   : > { %s1952_s29 = scalar_lea.vmem %s286_s17, 128  ;;  %p1960_p4 = scmp.lt.s32.totalorder %s286_s17, %s286_s17 }
  0x1b   : > { %p1953_p2 = scmp.ne.s32.totalorder %s286_s17, %s1952_s29  ;;  %p1961_p1 = scmp.lt.s32.totalorder %s1952_s29, %s1952_s29 }
  0x1d   : > { %p1955_p3 = pnand %p1953_p2, %p1941_p10  ;;  %p1962_p5 = por %p1961_p1, %p1960_p4 }
  0x1f   : > { %p1956_p7 = pneg %p1955_p3 }
  0x21   : > { %p1963_p6 = pnand %p1962_p5, %p1956_p7 }
  0x23   : > { %1966 = shalt.err (!%p1963_p6)
}
  0x24   : > { %s2038_s30 = smov 64   ;;  %s2039_s16 = smov 4  }
  0x25   : > { %1845 = dma.hbm_to_vmem [thread:$0]  (!%p2138_p8), %s2448_s0, 128, %s286_s17, [#allocation5], %s2038_s30, %s2038_s30, %s2039_s16  }
  0x26   : > { %p96_p9 = scmp.eq.s32.totalorder %s95_s21, 0  ;;  %p105_p10 = scmp.ne.s32.totalorder %s2031_s11, %s2027_s10 }
  0x27   : > { %p106_p1 = scmp.eq.s32.totalorder %s2035_s12, 0  ;;  %p1851_p4 = scmp.lt.s32.totalorder %s2035_s12, 2 }
  0x28   : > { %s2169_s24 = scalar_select %p96_p9, %s2031_s11, %s98_s20  }
  0x29   : > { %p107_p5 = por %p106_p1, %p105_p10  ;;  %s310_s25 = sand.u32 1, %s2031_s11  }
  0x2a   : > { %s1636_s26 = sshll.u32 %s2035_s12, 4  ;;  %s313_s27 = scalar_lea.vmem [#allocation6], %s310_s25 }
  0x2b   : > { %s320_s28 = sshll.u32 %s313_s27, 4  ;;  %s2176_s9 = scalar_lea.hbm %s2451_s3, %s1636_s26  ;;  %s2178_s28 = int_to_ptr.vmem [resolvable:$true] %s320_s28 }
  0x2c   : > { %p2180_p6 = pnand %p1851_p4, %p107_p5  ;;  %s311_s12 = scalar_lea.sflag [#allocation7], %s310_s25 }
  0x2d   : > { %s1967_s18 = scalar_lea.hbm %s2176_s9, 16  ;;  %s1972_s21 = scalar_lea.hbm %s2451_s3, 32 }
  0x2e   : > { %p1968_p8 = scmp.ne.s32.totalorder %s2176_s9, %s1967_s18  ;;  %p1969_p11 = pneg %p2180_p6 }
  0x2f   : > { %p1973_p0 = scmp.lt.u32.totalorder %s2176_s9, %s2451_s3  ;;  %p1974_p2 = scmp.lt.u32.totalorder %s1972_s21, %s1967_s18 }
  0x30   : > { %p1970_p12 = pnand %p1969_p11, %p1968_p8  ;;  %p1976_p7 = scmp.lt.u32.totalorder %s1967_s18, %s2176_s9 }
  0x31   : > { %p1975_p3 = por %p1974_p2, %p1973_p0 }
  0x32   : > { %p1971_p13 = pneg %p1970_p12 }
  0x33   : > { %p1977_p9 = por %p1976_p7, %p1975_p3 }
  0x35   : > { %p1978_p10 = pnand %p1977_p9, %p1971_p13 }
  0x37   : > { %1981 = shalt.err (!%p1978_p10)
}
  0x38   : > { %s1982_s22 = scalar_lea.vmem %s2178_s28, 16  ;;  %s2040_s23 = smov [#allocation6]  }
  0x39   : > { %p1983_p1 = scmp.ne.s32.totalorder %s2178_s28, %s1982_s22  ;;  %s1987_s25 = sshll.u32 %s2040_s23, 4  ;;  %s1988_s25 = int_to_ptr.vmem [resolvable:$false] %s1987_s25 }
  0x3a   : > { %s1989_s26 = scalar_lea.vmem %s1988_s25, 32  ;;  %p1990_p8 = scmp.lt.s32.totalorder %s2178_s28, %s1988_s25 }
  0x3b   : > { %p1985_p4 = pnand %p1983_p1, %p1969_p11  ;;  %p1991_p12 = scmp.lt.s32.totalorder %s1989_s26, %s1982_s22 }
  0x3d   : > { %p1986_p5 = pneg %p1985_p4  ;;  %p1992_p0 = por %p1991_p12, %p1990_p8 }
  0x3f   : > { %p1993_p2 = pnand %p1992_p0, %p1986_p5 }
  0x41   : > { %1996 = shalt.err (!%p1993_p2)
}
  0x42   : > { %1849 = dma.hbm_to_vmem [thread:$0]  (!%p2180_p6), %s2176_s9, 16, %s2178_s28, %s311_s12  }
  0x43   : > { %p2470_p13 = scmp.ne.s32.totalorder %s2466_s15, 0 }
  0x44   : > { %p2471_p11 = scmp.eq.s32.totalorder (!%p2470_p13), %s2117_s13, 0 }
  0x45   : > { %366 = sbr.rel (%p2470_p13) target bundleno = 3601 (0xe11), region = 56 }
  0x4c   : > { %2014 = dma.done.wait (%p2471_p11), [#allocation5], 128   ;;  %p2472_p3 = pmov %p2471_p11 }
  0x4d   : > { %s372_s27 = sand.u32 1, %s2027_s10   ;;  %p2473_p7 = scmp.ne.s32.totalorder %s2465_s14, 0 }
  0x4e   : > { %2016 = vsyncadd (%p2472_p3), [#allocation5], 4294967168  ;;  %s373_s29 = scalar_lea.sflag [#allocation7], %s372_s27  ;;  %s2216_s18 = scalar_lea.vmem [#allocation6], %s372_s27 }
  0x4f   : > { %2018 = dma.done.wait (%p2473_p7), %s373_s29, 16  }
  0x50   : > { %2020 = vsyncadd (%p2473_p7), %s373_s29, 4294967280  ;;  %p431_p6 = scmp.lt.s32.totalorder %s2117_s13, 1  ;;  %p2474_p9 = scmp.ne.s32.totalorder %s2117_s13, 0 }
  0x51   : > { %v1690_v1 = vld [vmem:[#allocation4] sm:$0xff] (!%p2474_p9)   ;;  %vm468_vm0 = vcmask (!%p2474_p9), 261120   ;;  %v496_v19 = vlaneseq (!%p2474_p9) }
  0x52   : > { %s2224_s9 = scalar_select %p431_p6, %s2117_s13, 1 }
  0x53   : > { %463 = sbr.rel (%p2474_p9) target bundleno = 405 (0x195), region = 68  ;;  %v1691_v2 = vunpack.c.l.bf16 (!%p2474_p9), %v1690_v1  ;;  %v1692_v3 = vunpack.c.h.bf16 (!%p2474_p9), %v1690_v1  ;;  %v497_v23 = vshrl.u32 (!%p2474_p9), %v496_v19, 7 }
  0x54   : > { %s1685_s15 = sshll.u32 %s2224_s9, 4  ;;  %s1688_s26 = sshll.u32 %s2224_s9, 5 }
  0x55   : > { %s2234_s21 = scalar_lea.vmem %s2450_s2, %s1685_s15  ;;  %s2239_s16 = scalar_lea.vmem %s2452_s4, %s1685_s15  ;;  %v469_v4 = vsel (!%p2474_p9), %vm468_vm0, %v1691_v2, 0.0  ;;  %v472_v5 = vsel (!%p2474_p9), %vm468_vm0, %v1692_v3, 0.0  ;;  %v498_v24 = vsub.s32 (!%p2474_p9), 6, %v497_v23  ;;  %v504_v27 = vsub.s32 (!%p2474_p9), 7, %v497_v23 }
  0x56   : > { %s2244_s25 = scalar_lea.vmem %s2453_s5, %s1685_s15  ;;  %s2250_s28 = scalar_lea.vmem %s2455_s7, %s1688_s26  ;;  %470 = vadd.xlane.f32.xlu0 (!%p2474_p9), %v469_v4 }
  0x57   : > { %s1647_s17 = sshll.u32 %s2224_s9, 3 }
  0x58   : > { %s457_s12 = scalar_lea.vmem %s2456_s8, %s1647_s17 }
  0x59   : > { %v2256_v0 = vld [vmem:[%s457_s12] sm:$0xff] }
  0x5a   : > { %473 = vadd.xlane.f32.xlu0 %v472_v5  ;;  %v499_v26 = vrot.slane %v2256_v0, %v498_v24  ;;  %v505_v30 = vrot.slane %v2256_v0, %v504_v27 }
  0xe3   : > { %v471_v6 = vpop.xlane.xlu0 %470 }
  0xe4   : > { %v476_v7 = vmul.f32 0.03125, %v471_v6 }
  0xe6   : > { %v478_v8 = vsub.f32 %v1691_v2, %v476_v7 }
  0xe7   : > { %v474_v9 = vpop.xlane.xlu0 %473 }
  0xe8   : > { %v477_v10 = vmul.f32 0.03125, %v474_v9  ;;  %v480_v11 = vmul.f32 %v478_v8, %v478_v8 }
  0xea   : > { %v479_v12 = vsub.f32 %v1692_v3, %v477_v10  ;;  %v482_v13 = vsel %vm468_vm0, %v480_v11, 0.0 }
  0xeb   : > { %483 = vadd.xlane.f32.xlu1 %v482_v13 }
  0xec   : > { %v481_v14 = vmul.f32 %v479_v12, %v479_v12 }
  0xee   : > { %v485_v15 = vsel %vm468_vm0, %v481_v14, 0.0 }
  0xef   : > { %486 = vadd.xlane.f32.xlu1 %v485_v15 }
 0x178   : > { %v484_v16 = vpop.xlane.xlu1 %483 }
 0x179   : > { %v488_v17 = vmul.f32 0.03125, %v484_v16 }
 0x17b   : > { %v490_v18 = vadd.f32 1e-12, %v488_v17 }
 0x17c   : > { %v487_v20 = vpop.xlane.xlu1 %486 }
 0x17d   : > { %1895 = vrsqrt.f32 %v490_v18  ;;  %v489_v21 = vmul.f32 0.03125, %v487_v20 }
 0x17f   : > { %v491_v22 = vadd.f32 1e-12, %v489_v21 }
 0x181   : > { %1897 = vrsqrt.f32 %v491_v22 }
 0x187   : > { %v1896_v25 = vpop.eup %1895 }
 0x188   : > { %v494_v28 = vmul.f32 %v1896_v25, %v478_v8 }
 0x18a   : > { %v500_v31 = vmul.f32 %v499_v26, %v494_v28 }
 0x18b   : > { %v1898_v29 = vpop.eup %1897 }
 0x18c   : > { %v495_v32 = vmul.f32 %v1898_v29, %v479_v12  ;;  %v506_v34 = vadd.f32 %v505_v30, %v500_v31 }
 0x18e   : > { %v501_v33 = vmul.f32 %v499_v26, %v495_v32 }
 0x190   : > { %v507_v35 = vadd.f32 %v505_v30, %v501_v33 }
 0x192   : > { %v508_v36 = vpack.c.bf16 %v507_v35, %v506_v34 }
 0x194   : > { %509 = vst.msk [vmem:[#allocation2] sm:$0xff] %vm468_vm0, %v508_v36 }
 0x195 PF: > { %v1899_v37 = vld [vmem:[%s2234_s21] sm:$0xff]   ;;  %v2041_v38 = vmov 0.0   ;;  %v1900_v39 = vld [vmem:[%s2234_s21 + $0x8] sm:$0xff]   ;;  %vm2042_vm1 = vmmov 0   ;;  %vm536_vm2 = vcmask 261120   ;;  %s2043_s15 = smov 112   ;;  %s2475_s27 = scalar_lea.vmem %s2454_s6, %s2224_s9 }
 0x196   : > { %1728 = vmatprep.subr.bf16.mxu1 %v2041_v38  ;;  %1742 = vmatprep.subr.bf16.mxu0 %v2041_v38  ;;  %v1649_v41 = vld [vmem:[%s2216_s18] ss:$0 sm:$0xff]  ;;  %s2044_s12 = smov 96   ;;  %s2045_s21 = smov 80   ;;  %vm592_vm3 = vcmask 130048   ;;  %vm639_vm4 = vcmask 64512  }
 0x197   : > { %1729 = vmatpush3.bf16.msra.mxu1 %v1899_v37  ;;  %1732 = vmatprep.mubr.msk.bf16.mxu1 %vm2042_vm1, %v2041_v38  ;;  %v1653_v54 = vld [vmem:[%s2449_s1] ss:$0 sm:$0xff]  ;;  %s2046_s30 = smov 64   ;;  %s2047_s22 = smov 48   ;;  %vm657_vm5 = vcmask 1043456   ;;  %v1901_v29 = vld [vmem:[%s2239_s16 + $0x8] sm:$0xff]  }
 0x198   : > { %1730 = vmatprep.subr.bf16.mxu1 %v2041_v38  ;;  %1744 = vmatprep.mubr.msk.bf16.mxu0 %vm2042_vm1, %v2041_v38  ;;  %v1902_v35 = vld [vmem:[%s2239_s16] sm:$0xff]   ;;  %vm1420_vm6 = vcmask 523264   ;;  %p1681_p10 = scmp.ne.s32.totalorder %s2117_s13, 1 }
 0x199   : > { %vm1511_vm7 = vcmask (!%p1681_p10), 260096  }
 0x19b   : > { %v2276_v40 = vld [vmem:[#allocation2] sm:$0xff]  ;;  %1731 = vmatpush3.bf16.msra.mxu1 %v1900_v39 }
 0x19c   : > { %1736 = vmatprep.subr.bf16.mxu1 %v2041_v38 }
 0x19e   : > { %1733 = vmatmul.mubr.msk.bf16.vlgmr.msra.gmra.mrb[0].mxu1 %vm536_vm2, %v2276_v40 }
 0x19f   : > { %1738 = vmatprep.mubr.msk.bf16.mxu1 %vm2042_vm1, %v2041_v38 }
 0x271   : > { %v574_v42 = vpop.f32.mrb[0].mxu1 }
 0x272   : > { %v1734_v43 = vpop.f32.mrb[1].mxu1  ;;  %v575_v45 = vadd.f32 %v1649_v41, %v574_v42  ;;  %v1663_v42 = vld [vmem:[%s2449_s1 + $0x1] ss:$0 sm:$0xff] }
 0x273   : > { %v577_v44 = vpop.f32.mrb[2].mxu1 }
 0x274   : > { %v578_v46 = vadd.f32 %v1649_v41, %v577_v44  ;;  %v1735_v47 = vpop.f32.mrb[3].mxu1 }
 0x276   : > { %v581_v48 = vpack.c.bf16 %v578_v46, %v575_v45 }
 0x278   : > { %704 = vrot.lane.b32.xlu1 %v581_v48, %s2043_s15  ;;  %590 = vrot.lane.b32.xlu0 %v581_v48, %s2044_s12  ;;  %v2305_v14 = vrot.slane %v581_v48, 4 }
 0x27c   : > { %706 = vrot.lane.b32.xlu0 %v581_v48, %s2045_s21 }
 0x2ea   : > { %v591_v49 = vpop.permute.xlu0 %590  ;;  %v705_v53 = vpop.permute.xlu1 %704 }
 0x2eb   : > { %v597_v50 = vsel %vm592_vm3, %v591_v49, 0 }
 0x2ec   : > { %1737 = vmatpush3.bf16.xpose.msra.mxu1 %v597_v50 }
 0x2ed   : > { %1748 = vmatprep.subr.bf16.mxu1 %v2041_v38 }
 0x2ee   : > { %v707_v51 = vpop.permute.xlu0 %706 }
 0x2ef   : > { %v712_v52 = vsel %vm592_vm3, %v707_v51, 0 }
 0x2f3   : > { %1739 = vmatmul.mubr.msk.bf16.vlgmr.msra.gmra.mrb[4].mxu1 %vm592_vm3, %v581_v48 }
 0x2f4   : > { %1749 = vmatpush3.bf16.xpose.msra.mxu1 %v712_v52  ;;  %1750 = vmatprep.mubr.msk.bf16.mxu1 %vm2042_vm1, %v2041_v38 }
 0x2f5   : > { %1760 = vmatprep.subr.bf16.mxu1 %v2041_v38 }
 0x2fb   : > { %1751 = vmatmul.mubr.msk.bf16.vlgmr.msra.gmra.mrb[8].mxu1 %vm592_vm3, %v705_v53 }
 0x2fc   : > { %1762 = vmatprep.mubr.msk.bf16.mxu1 %vm2042_vm1, %v2041_v38  ;;  %1761 = vmatpush3.bf16.msra.mxu1 %v1901_v29 }
 0x2fd   : > { %1766 = vmatprep.subr.bf16.mxu1 %v2041_v38 }
 0x3c6   : > { %v633_v55 = vpop.f32.mrb[4].mxu1 }
 0x3c7   : > { %v634_v56 = vadd.f32 %v1653_v54, %v633_v55  ;;  %v1740_v57 = vpop.f32.mrb[5].mxu1 }
 0x3c8   : > { %v636_v58 = vpop.f32.mrb[6].mxu1 }
 0x3c9   : > { %v1741_v59 = vpop.f32.mrb[7].mxu1  ;;  %v640_v60 = vsel %vm639_vm4, %v634_v56, -inf }
 0x3ca   : > { %641 = vmax.xlane.f32.xlu1 %v640_v60 }
 0x3ce   : > { %v748_v61 = vpop.f32.mrb[8].mxu1 }
 0x3cf   : > { %v749_v62 = vadd.f32 %v1653_v54, %v748_v61  ;;  %v1752_v63 = vpop.f32.mrb[9].mxu1 }
 0x3d0   : > { %v751_v1 = vpop.f32.mrb[10].mxu1 }
 0x3d1   : > { %v1753_v2 = vpop.f32.mrb[11].mxu1  ;;  %v754_v3 = vsel %vm639_vm4, %v749_v62, -inf }
 0x3d2   : > { %755 = vmax.xlane.f32.xlu0 %v754_v3 }
 0x457   : > { %v642_v4 = vpop.xlane.xlu1 %641 }
 0x458   : > { %v643_v5 = vsub.f32 %v634_v56, %v642_v4 }
 0x45a   : > { %v644_v6 = vmul.f32 1.442695, %v643_v5  ;;  %v1252_v5 = vlaneseq }
 0x45c   : > { %1911 = vpow2.f32 %v644_v6  ;;  %v2354_v6 = vshrl.u32 %v1252_v5, 7 }
 0x45f   : > { %v756_v7 = vpop.xlane.xlu0 %755 }
 0x460   : > { %v757_v8 = vsub.f32 %v749_v62, %v756_v7  ;;  %v511_v7 = vunpack.c.l.bf16 %v2276_v40 }
 0x462   : > { %v758_v9 = vmul.f32 1.442695, %v757_v8  ;;  %v1254_v8 = vsub.s32 0, %v2354_v6 }
 0x464   : > { %1913 = vpow2.f32 %v758_v9 }
 0x466   : > { %v1912_v10 = vpop.eup %1911 }
 0x467   : > { %v646_v11 = vsel %vm639_vm4, %v1912_v10, 0.0 }
 0x468   : > { %647 = vadd.xlane.f32.xlu0 %v646_v11  ;;  %v2359_v11 = vrot.slane %v2256_v0, %v1254_v8 }
 0x46e   : > { %v1914_v12 = vpop.eup %1913 }
 0x46f   : > { %v760_v13 = vsel %vm639_vm4, %v1914_v12, 0.0 }
 0x470   : > { %761 = vadd.xlane.f32.xlu1 %v760_v13 }
 0x47e   : > { %652 = vrot.lane.b32.xlu0 %v581_v48, %s2046_s30 }
 0x481   : > { %766 = vrot.lane.b32.xlu1 %v581_v48, %s2047_s22 }
 0x482   : > { %1038 = vrot.lane.b32.xlu0 %v2305_v14, %s2045_s21 }
 0x485   : > { %925 = vrot.lane.b32.xlu1 %v2305_v14, %s2044_s12 }
 0x489   : > { %1036 = vrot.lane.b32.xlu1 %v2305_v14, %s2043_s15 }
 0x4f5   : > { %v648_v15 = vpop.xlane.xlu0 %647 }
 0x4f6   : > { %1915 = vrcp.f32 %v648_v15 }
 0x4f9   : > { %v653_v16 = vpop.permute.xlu0 %652 }
 0x4fa   : > { %v659_v17 = vsel %vm657_vm5, %v653_v16, 0 }
 0x4fb   : > { %1743 = vmatpush3.bf16.msra.mxu0 %v659_v17 }
 0x4fc   : > { %1754 = vmatprep.subr.bf16.mxu0 %v2041_v38 }
 0x4fd   : > { %v762_v18 = vpop.xlane.xlu1 %761  ;;  %v1039_v47 = vpop.permute.xlu0 %1038 }
 0x4fe   : > { %1917 = vrcp.f32 %v762_v18  ;;  %v1044_v51 = vsel %vm592_vm3, %v1039_v47, 0 }
 0x500   : > { %v1916_v19 = vpop.eup %1915 }
 0x501   : > { %v650_v20 = vmul.f32 %v1916_v19, %v1912_v10  ;;  %v767_v21 = vpop.permute.xlu1 %766 }
 0x502   : > { %v772_v23 = vsel %vm657_vm5, %v767_v21, 0 }
 0x503   : > { %v651_v22 = vpack.c.bf16 %v650_v20, %v650_v20 }
 0x505   : > { %1745 = vmatmul.mubr.msk.bf16.vlgmr.msra.gmra.mrb[0].mxu0 %vm639_vm4, %v651_v22  ;;  %v926_v26 = vpop.permute.xlu1 %925 }
 0x506   : > { %1755 = vmatpush3.bf16.msra.mxu0 %v772_v23  ;;  %1756 = vmatprep.mubr.msk.bf16.mxu0 %vm2042_vm1, %v2041_v38  ;;  %v931_v28 = vsel %vm592_vm3, %v926_v26, 0 }
 0x507   : > { %1772 = vmatprep.subr.bf16.mxu0 %v2041_v38 }
 0x508   : > { %v1918_v24 = vpop.eup %1917 }
 0x509   : > { %v764_v25 = vmul.f32 %v1918_v24, %v1914_v12  ;;  %v1037_v52 = vpop.permute.xlu1 %1036 }
 0x50b   : > { %v765_v27 = vpack.c.bf16 %v764_v25, %v764_v25 }
 0x50d   : > { %1757 = vmatmul.mubr.msk.bf16.vlgmr.msra.gmra.mrb[4].mxu0 %vm639_vm4, %v765_v27 }
 0x50e   : > { %1774 = vmatprep.mubr.msk.bf16.mxu0 %vm2042_vm1, %v2041_v38 }
 0x50f   : > { %1773 = vmatpush3.bf16.xpose.msra.mxu0 %v931_v28 }
 0x510   : > { %1778 = vmatprep.subr.bf16.mxu0 %v2041_v38 }
 0x516   : > { %1775 = vmatmul.mubr.msk.bf16.vlgmr.msra.gmra.mrb[8].mxu0 %vm592_vm3, %v2305_v14 }
 0x517   : > { %1780 = vmatprep.mubr.msk.bf16.mxu0 %vm2042_vm1, %v2041_v38 }
 0x5d8   : > { %v695_v30 = vpop.f32.mrb[0].mxu0 }
 0x5d9   : > { %v1746_v31 = vpop.f32.mrb[1].mxu0  ;;  %v701_v50 = vpack.c.bf16 %v695_v30, %v695_v30 }
 0x5da   : > { %v698_v32 = vpop.f32.mrb[2].mxu0  ;;  %v1903_v31 = vld [vmem:[%s2239_s16 + $0x8] sm:$0xff]  }
 0x5db   : > { %v1747_v33 = vpop.f32.mrb[3].mxu0 }
 0x5e0   : > { %v808_v34 = vpop.f32.mrb[4].mxu0 }
 0x5e1   : > { %v814_v36 = vpack.c.bf16 %v808_v34, %v808_v34  ;;  %v1758_v37 = vpop.f32.mrb[5].mxu0 }
 0x5e2   : > { %v811_v39 = vpop.f32.mrb[6].mxu0 }
 0x5e3   : > { %v1759_v41 = vpop.f32.mrb[7].mxu0  ;;  %1763 = vmatmul.mubr.msk.bf16.vlgmr.msra.gmra.mrb[12].mxu1 %vm592_vm3, %v814_v36 }
 0x5e4   : > { %1767 = vmatpush3.bf16.msra.mxu1 %v1902_v35  ;;  %1768 = vmatprep.mubr.msk.bf16.mxu1 %vm2042_vm1, %v2041_v38 }
 0x5e5   : > { %1784 = vmatprep.subr.bf16.mxu1 %v2041_v38 }
 0x5e9   : > { %v967_v43 = vpop.f32.mrb[8].mxu0 }
 0x5ea   : > { %v968_v44 = vadd.f32 %v1663_v42, %v967_v43  ;;  %v1776_v45 = vpop.f32.mrb[9].mxu0 }
 0x5eb   : > { %v970_v46 = vpop.f32.mrb[10].mxu0 }
 0x5ec   : > { %v1777_v48 = vpop.f32.mrb[11].mxu0  ;;  %v973_v49 = vsel %vm639_vm4, %v968_v44, -inf }
 0x5ed   : > { %974 = vmax.xlane.f32.xlu0 %v973_v49 }
 0x5ef   : > { %1769 = vmatmul.mubr.msk.bf16.vlgmr.msra.gmra.mrb[12].mxu1 %vm592_vm3, %v701_v50 }
 0x5f0   : > { %1785 = vmatpush3.bf16.xpose.msra.mxu1 %v1044_v51  ;;  %1786 = vmatprep.mubr.msk.bf16.mxu1 %vm2042_vm1, %v2041_v38 }
 0x5f1   : > { %1796 = vmatprep.subr.bf16.mxu1 %v2041_v38 }
 0x5f7   : > { %1787 = vmatmul.mubr.msk.bf16.vlgmr.msra.gmra.mrb[16].mxu1 %vm592_vm3, %v1037_v52 }
 0x5f8   : > { %1798 = vmatprep.mubr.msk.bf16.mxu1 %vm2042_vm1, %v2041_v38  ;;  %1797 = vmatpush3.bf16.msra.mxu1 %v1903_v31 }
 0x5f9   : > { %1802 = vmatprep.subr.bf16.mxu1 %v2041_v38 }
 0x67a   : > { %v975_v53 = vpop.xlane.xlu0 %974 }
 0x67b   : > { %v976_v54 = vsub.f32 %v968_v44, %v975_v53  ;;  %v1904_v44 = vld [vmem:[%s2239_s16] sm:$0xff]  }
 0x67d   : > { %v977_v55 = vmul.f32 1.442695, %v976_v54  ;;  %v512_v54 = vunpack.c.h.bf16 %v2276_v40 }
 0x67f   : > { %1919 = vpow2.f32 %v977_v55 }
 0x689   : > { %v1920_v56 = vpop.eup %1919 }
 0x68a   : > { %v979_v57 = vsel %vm639_vm4, %v1920_v56, 0.0 }
 0x68b   : > { %980 = vadd.xlane.f32.xlu0 %v979_v57 }
 0x6c2   : > { %v909_v58 = vpop.f32.mrb[12].mxu1 }
 0x6c3   : > { %915 = vst.msk [vmem:[#allocation3] sm:$0xff] %vm536_vm2, %v909_v58  ;;  %v1770_v59 = vpop.f32.mrb[13].mxu1 }
 0x6c4   : > { %v912_v60 = vpop.f32.mrb[14].mxu1 }
 0x6c5   : > { %v1771_v61 = vpop.f32.mrb[15].mxu1 }
 0x6ca   : > { %v1080_v62 = vpop.f32.mrb[16].mxu1  ;;  %v1248_v9 = vld [vmem:[#allocation3] sm:$0xff] }
 0x6cb   : > { %v1081_v63 = vadd.f32 %v1663_v42, %v1080_v62  ;;  %v1788_v1 = vpop.f32.mrb[17].mxu1  ;;  %v1250_v10 = vadd.f32 %v1248_v9, %v511_v7  ;;  %v1287_v9 = vsub.s32 1, %v2354_v6 }
 0x6cc   : > { %v1083_v2 = vpop.f32.mrb[18].mxu1  ;;  %v1905_v1 = vld [vmem:[%s2244_s25] sm:$0xff]  }
 0x6cd   : > { %v1789_v3 = vpop.f32.mrb[19].mxu1  ;;  %v1086_v4 = vsel %vm639_vm4, %v1081_v63, -inf  ;;  %v1256_v12 = vadd.f32 %v2359_v11, %v1250_v10  ;;  %v1906_v2 = vld [vmem:[%s2244_s25 + $0x8] sm:$0xff]  }
 0x6ce   : > { %1087 = vmax.xlane.f32.xlu1 %v1086_v4 }
 0x6cf   : > { %v1258_v13 = vsel %vm536_vm2, %v1256_v12, 0.0 }
 0x6df   : > { %985 = vrot.lane.b32.xlu1 %v2305_v14, %s2046_s30 }
 0x703   : > { %1259 = vadd.xlane.f32.xlu1 %v1258_v13  ;;  %v1293_v13 = vsub.s32 2, %v2354_v6 }
 0x718   : > { %v981_v15 = vpop.xlane.xlu0 %980 }
 0x719   : > { %1921 = vrcp.f32 %v981_v15 }
 0x723   : > { %v1922_v16 = vpop.eup %1921 }
 0x724   : > { %v983_v19 = vmul.f32 %v1922_v16, %v1920_v56 }
 0x726   : > { %v984_v23 = vpack.c.bf16 %v983_v19, %v983_v19 }
 0x75b   : > { %v1088_v17 = vpop.xlane.xlu1 %1087 }
 0x75c   : > { %v1089_v18 = vsub.f32 %v1081_v63, %v1088_v17 }
 0x75e   : > { %v1090_v20 = vmul.f32 1.442695, %v1089_v18  ;;  %v1294_v18 = vrot.slane %v2256_v0, %v1293_v13 }
 0x75f   : > { %v986_v21 = vpop.permute.xlu1 %985 }
 0x760   : > { %1923 = vpow2.f32 %v1090_v20  ;;  %v991_v22 = vsel %vm657_vm5, %v986_v21, 0 }
 0x761   : > { %1779 = vmatpush3.bf16.msra.mxu0 %v991_v22 }
 0x762   : > { %1790 = vmatprep.subr.bf16.mxu0 %v2041_v38 }
 0x764   : > { %1781 = vmatmul.mubr.msk.bf16.vlgmr.msra.gmra.mrb[12].mxu0 %vm639_vm4, %v984_v23  ;;  %v1907_v23 = vld [vmem:[%s2250_s28] sm:$0xff]  }
 0x765   : > { %1792 = vmatprep.mubr.msk.bf16.mxu0 %vm2042_vm1, %v2041_v38 }
 0x76a   : > { %v1924_v24 = vpop.eup %1923 }
 0x76b   : > { %v1092_v25 = vsel %vm639_vm4, %v1924_v24, 0.0 }
 0x76c   : > { %1093 = vadd.xlane.f32.xlu0 %v1092_v25  ;;  %v1909_v25 = vld [vmem:[%s2250_s28 + $0x10] sm:$0xff]  }
 0x782   : > { %1098 = vrot.lane.b32.xlu0 %v2305_v14, %s2047_s22 }
 0x790   : > { %v1260_v26 = vpop.xlane.xlu1 %1259 }
 0x791   : > { %v1265_v27 = vmul.f32 0.03125, %v1260_v26  ;;  %v1910_v26 = vld [vmem:[%s2250_s28 + $0x18] sm:$0xff]  }
 0x793   : > { %v2371_v28 = vsub.f32 %v1256_v12, %v1265_v27  ;;  %v1672_v27 = vld [vmem:[%s2475_s27] ss:$0 sm:$0xff] }
 0x795   : > { %v1269_v29 = vmul.f32 %v2371_v28, %v2371_v28 }
 0x797   : > { %v1271_v30 = vsel %vm536_vm2, %v1269_v29, 0.0 }
 0x798   : > { %1272 = vadd.xlane.f32.xlu1 %v1271_v30 }
 0x7f9   : > { %v1094_v32 = vpop.xlane.xlu0 %1093 }
 0x7fa   : > { %1925 = vrcp.f32 %v1094_v32 }
 0x7fd   : > { %v1099_v33 = vpop.permute.xlu0 %1098 }
 0x7fe   : > { %v1104_v14 = vsel %vm657_vm5, %v1099_v33, 0 }
 0x7ff   : > { %1791 = vmatpush3.bf16.msra.mxu0 %v1104_v14 }
 0x800   : > { %1808 = vmatprep.subr.bf16.mxu0 %v2041_v38 }
 0x804   : > { %v1926_v34 = vpop.eup %1925 }
 0x805   : > { %v1096_v35 = vmul.f32 %v1926_v34, %v1924_v24  ;;  %v1908_v24 = vld [vmem:[%s2250_s28 + $0x8] sm:$0xff]   ;;  %s2476_s28 = sld [smem:[#allocation11_spill]] (!%p1681_p10) }
 0x807   : > { %v1097_v36 = vpack.c.bf16 %v1096_v35, %v1096_v35 }
 0x809   : > { %1793 = vmatmul.mubr.msk.bf16.vlgmr.msra.gmra.mrb[16].mxu0 %vm639_vm4, %v1097_v36 }
 0x80a   : > { %1812 = vmatprep.mubr.msk.bf16.mxu0 %vm2042_vm1, %v2041_v38  ;;  %1809 = vmatpush3.bf16.msra.mxu0 %v1905_v1 }
 0x80b   : > { %1810 = vmatprep.subr.bf16.mxu0 %v2041_v38 }
 0x80e   : > { %1811 = vmatpush3.bf16.msra.mxu0 %v1906_v2 }
 0x80f   : > { %1816 = vmatprep.subr.bf16.mxu0 %v2041_v38 }
 0x825   : > { %v1273_v40 = vpop.xlane.xlu1 %1272 }
 0x826   : > { %v1277_v3 = vmul.f32 0.03125, %v1273_v40 }
 0x828   : > { %v1279_v4 = vadd.f32 1e-12, %v1277_v3 }
 0x82a   : > { %1927 = vrsqrt.f32 %v1279_v4 }
 0x834   : > { %v1928_v10 = vpop.eup %1927 }
 0x835   : > { %v1283_v12 = vmul.f32 %v1928_v10, %v2371_v28 }
 0x837   : > { %v1027_v37 = vpop.f32.mrb[12].mxu0 }
 0x838   : > { %v1782_v39 = vpop.f32.mrb[13].mxu0  ;;  %v1033_v49 = vpack.c.bf16 %v1027_v37, %v1027_v37 }
 0x839   : > { %v1030_v41 = vpop.f32.mrb[14].mxu0 }
 0x83a   : > { %v1783_v42 = vpop.f32.mrb[15].mxu0 }
 0x8dc   : > { %v1140_v43 = vpop.f32.mrb[16].mxu0 }
 0x8dd   : > { %v1146_v45 = vpack.c.bf16 %v1140_v43, %v1140_v43  ;;  %v1794_v46 = vpop.f32.mrb[17].mxu0 }
 0x8de   : > { %v1143_v47 = vpop.f32.mrb[18].mxu0 }
 0x8df   : > { %v1795_v48 = vpop.f32.mrb[19].mxu0  ;;  %1799 = vmatmul.mubr.msk.bf16.vlgmr.msra.gmra.mrb[20].mxu1 %vm592_vm3, %v1146_v45 }
 0x8e0   : > { %1803 = vmatpush3.bf16.msra.mxu1 %v1904_v44  ;;  %1804 = vmatprep.mubr.msk.bf16.mxu1 %vm2042_vm1, %v2041_v38 }
 0x8eb   : > { %1805 = vmatmul.mubr.msk.bf16.vlgmr.msra.gmra.mrb[20].mxu1 %vm592_vm3, %v1033_v49 }
 0x9be   : > { %v1241_v50 = vpop.f32.mrb[20].mxu1 }
 0x9bf   : > { %1247 = vst.msk [vmem:[#allocation3 + $0x8] sm:$0xff] %vm536_vm2, %v1241_v50  ;;  %v1806_v51 = vpop.f32.mrb[21].mxu1 }
 0x9c0   : > { %v1244_v52 = vpop.f32.mrb[22].mxu1 }
 0x9c1   : > { %v1807_v53 = vpop.f32.mrb[23].mxu1 }
 0x9c2   : > { %v1394_v53 = vsub.s32 3, %v2354_v6 }
 0x9c6   : > { %v1249_v55 = vld [vmem:[#allocation3 + $0x8] sm:$0xff] }
 0x9c7   : > { %v1251_v56 = vadd.f32 %v1249_v55, %v512_v54  ;;  %v1395_v54 = vrot.slane %v2256_v0, %v1394_v53 }
 0x9c9   : > { %v1257_v57 = vadd.f32 %v2359_v11, %v1251_v56  ;;  %v1288_v11 = vrot.slane %v2256_v0, %v1287_v9 }
 0x9cb   : > { %v1261_v58 = vsel %vm536_vm2, %v1257_v57, 0.0  ;;  %v1289_v16 = vmul.f32 %v1288_v11, %v1283_v12 }
 0x9cc   : > { %1262 = vadd.xlane.f32.xlu0 %v1261_v58 }
 0x9cd   : > { %v1295_v20 = vadd.f32 %v1294_v18, %v1289_v16 }
 0xa59   : > { %v1263_v59 = vpop.xlane.xlu0 %1262 }
 0xa5a   : > { %v1266_v60 = vmul.f32 0.03125, %v1263_v59 }
 0xa5c   : > { %v1268_v61 = vsub.f32 %v1257_v57, %v1266_v60 }
 0xa5e   : > { %v1270_v62 = vmul.f32 %v1268_v61, %v1268_v61 }
 0xa60   : > { %v1274_v63 = vsel %vm536_vm2, %v1270_v62, 0.0 }
 0xa61   : > { %1275 = vadd.xlane.f32.xlu0 %v1274_v63 }
 0xaee   : > { %v1276_v5 = vpop.xlane.xlu0 %1275 }
 0xaef   : > { %v1278_v7 = vmul.f32 0.03125, %v1276_v5 }
 0xaf1   : > { %v1280_v8 = vadd.f32 1e-12, %v1278_v7 }
 0xaf3   : > { %1929 = vrsqrt.f32 %v1280_v8 }
 0xafd   : > { %v1930_v15 = vpop.eup %1929 }
 0xafe   : > { %v1284_v17 = vmul.f32 %v1930_v15, %v1268_v61 }
 0xb00   : > { %v1290_v19 = vmul.f32 %v1288_v11, %v1284_v17 }
 0xb02   : > { %v1296_v21 = vadd.f32 %v1294_v18, %v1290_v19  ;;  %v1495_v19 = vsub.s32 4, %v2354_v6 }
 0xb04   : > { %v1297_v22 = vpack.c.bf16 %v1296_v21, %v1295_v20 }
 0xb06   : > { %1813 = vmatmul.mubr.msk.bf16.vlgmr.msra.gmra.mrb[20].mxu0 %vm536_vm2, %v1297_v22 }
 0xb07   : > { %1824 = vmatprep.mubr.msk.bf16.mxu0 %vm2042_vm1, %v2041_v38  ;;  %1817 = vmatpush3.bf16.msra.mxu0 %v1907_v23 }
 0xb08   : > { %1818 = vmatprep.subr.bf16.mxu0 %v2041_v38 }
 0xb0b   : > { %1819 = vmatpush3.bf16.msra.mxu0 %v1908_v24 }
 0xb0c   : > { %1820 = vmatprep.subr.bf16.mxu0 %v2041_v38 }
 0xb0f   : > { %1821 = vmatpush3.bf16.msra.mxu0 %v1909_v25 }
 0xb10   : > { %1822 = vmatprep.subr.bf16.mxu0 %v2041_v38 }
 0xb13   : > { %1823 = vmatpush3.bf16.msra.mxu0 %v1910_v26 }
 0xbd9   : > { %v1358_v28 = vpop.f32.mrb[20].mxu0 }
 0xbda   : > { %v1359_v29 = vadd.f32 %v1672_v27, %v1358_v28  ;;  %v1814_v30 = vpop.f32.mrb[21].mxu0 }
 0xbdb   : > { %v1361_v31 = vpop.f32.mrb[22].mxu0 }
 0xbdc   : > { %v1365_v32 = vmul.f32 %v1359_v29, %v1359_v29  ;;  %v1362_v33 = vadd.f32 %v1672_v27, %v1361_v31  ;;  %v1815_v14 = vpop.f32.mrb[23].mxu0 }
 0xbde   : > { %v1367_v34 = vmul.f32 %v1365_v32, %v1359_v29  ;;  %v1366_v35 = vmul.f32 %v1362_v33, %v1362_v33 }
 0xbe0   : > { %v1369_v36 = vmul.f32 0.044715, %v1367_v34  ;;  %v1368_v37 = vmul.f32 %v1366_v35, %v1362_v33 }
 0xbe2   : > { %v1371_v39 = vadd.f32 %v1369_v36, %v1359_v29  ;;  %v1370_v38 = vmul.f32 0.044715, %v1368_v37 }
 0xbe4   : > { %v1373_v41 = vmul.f32 0.7978846, %v1371_v39  ;;  %v1372_v42 = vadd.f32 %v1370_v38, %v1362_v33 }
 0xbe6   : > { %1931 = vtanh.f32 %v1373_v41  ;;  %v1374_v43 = vmul.f32 0.7978846, %v1372_v42 }
 0xbe8   : > { %1933 = vtanh.f32 %v1374_v43 }
 0xbf0   : > { %v1932_v44 = vpop.eup %1931 }
 0xbf1   : > { %v1377_v45 = vadd.f32 1.0, %v1932_v44 }
 0xbf2   : > { %v1934_v46 = vpop.eup %1933 }
 0xbf3   : > { %v1379_v47 = vmul.f32 0.5, %v1377_v45  ;;  %v1378_v48 = vadd.f32 1.0, %v1934_v46 }
 0xbf5   : > { %v1380_v49 = vmul.f32 0.5, %v1378_v48  ;;  %v1381_v50 = vmul.f32 %v1379_v47, %v1359_v29 }
 0xbf7   : > { %v1382_v51 = vmul.f32 %v1380_v49, %v1362_v33 }
 0xbf9   : > { %v1383_v52 = vpack.c.bf16 %v1382_v51, %v1381_v50 }
 0xbfb   : > { %1825 = vmatmul.mubr.msk.bf16.vlgmr.msra.gmra.mrb[24].mxu0 %vm1420_vm6, %v1383_v52 }
 0xcce   : > { %v1458_v55 = vpop.f32.mrb[24].mxu0 }
 0xccf   : > { %v1459_v56 = vadd.f32 %v1458_v55, %v1395_v54  ;;  %v1826_v57 = vpop.f32.mrb[25].mxu0 }
 0xcd0   : > { %v1461_v58 = vpop.f32.mrb[26].mxu0 }
 0xcd1   : > { %v1462_v59 = vadd.f32 %v1461_v58, %v1395_v54  ;;  %v1827_v60 = vpop.f32.mrb[27].mxu0  ;;  %v1465_v61 = vadd.f32 %v1459_v56, %v1295_v20  ;;  %v1496_v20 = vrot.slane %v2256_v0, %v1495_v19 }
 0xcd3   : > { %v1467_v62 = vsel %vm536_vm2, %v1465_v61, 0.0  ;;  %v1466_v63 = vadd.f32 %v1462_v59, %v1296_v21  ;;  %v1501_v21 = vsub.s32 5, %v2354_v6 }
 0xcd4   : > { %1468 = vadd.xlane.f32.xlu1 %v1467_v62 }
 0xcd5   : > { %v1470_v1 = vsel %vm536_vm2, %v1466_v63, 0.0  ;;  %v1502_v25 = vrot.slane %v2256_v0, %v1501_v21 }
 0xcd6   : > { %1471 = vadd.xlane.f32.xlu0 %v1470_v1 }
 0xd61   : > { %v1469_v2 = vpop.xlane.xlu1 %1468 }
 0xd62   : > { %v1473_v40 = vmul.f32 0.03125, %v1469_v2 }
 0xd63   : > { %v1472_v3 = vpop.xlane.xlu0 %1471 }
 0xd64   : > { %v1475_v4 = vsub.f32 %v1465_v61, %v1473_v40  ;;  %v1474_v5 = vmul.f32 0.03125, %v1472_v3 }
 0xd66   : > { %v1476_v7 = vsub.f32 %v1466_v63, %v1474_v5  ;;  %v1477_v8 = vmul.f32 %v1475_v4, %v1475_v4 }
 0xd68   : > { %v1479_v9 = vsel %vm536_vm2, %v1477_v8, 0.0  ;;  %v1478_v10 = vmul.f32 %v1476_v7, %v1476_v7 }
 0xd69   : > { %1480 = vadd.xlane.f32.xlu1 %v1479_v9 }
 0xd6a   : > { %v1482_v11 = vsel %vm536_vm2, %v1478_v10, 0.0 }
 0xd6b   : > { %1483 = vadd.xlane.f32.xlu0 %v1482_v11 }
 0xdf6   : > { %v1481_v12 = vpop.xlane.xlu1 %1480 }
 0xdf7   : > { %v1485_v13 = vmul.f32 0.03125, %v1481_v12 }
 0xdf8   : > { %v1484_v15 = vpop.xlane.xlu0 %1483 }
 0xdf9   : > { %v1487_v16 = vadd.f32 1e-12, %v1485_v13  ;;  %v1486_v17 = vmul.f32 0.03125, %v1484_v15 }
 0xdfb   : > { %1935 = vrsqrt.f32 %v1487_v16  ;;  %v1488_v18 = vadd.f32 1e-12, %v1486_v17 }
 0xdfd   : > { %1937 = vrsqrt.f32 %v1488_v18 }
 0xe05   : > { %v1936_v22 = vpop.eup %1935 }
 0xe06   : > { %v1491_v23 = vmul.f32 %v1936_v22, %v1475_v4 }
 0xe07   : > { %v1938_v24 = vpop.eup %1937 }
 0xe08   : > { %v1497_v26 = vmul.f32 %v1496_v20, %v1491_v23  ;;  %v1492_v27 = vmul.f32 %v1938_v24, %v1476_v7 }
 0xe0a   : > { %v1498_v28 = vmul.f32 %v1496_v20, %v1492_v27  ;;  %v1503_v29 = vadd.f32 %v1502_v25, %v1497_v26  ;;  %1510 = sbr.rel (%p1681_p10) target bundleno = 3601 (0xe11), region = 72 }
 0xe0c   : > { %v1504_v30 = vadd.f32 %v1502_v25, %v1498_v28  ;;  %1512 = vst.msk [vmem:[%s2476_s28] sm:$0x7f] (!%p1681_p10), %vm1511_vm7, %v1503_v29 }
 0xe0e   : > { %v1505_v31 = vpack.c.bf16 %v1504_v30, %v1503_v29  ;;  %1682 = vst.msk [vmem:[%s2476_s28 + $0x8] sm:$0x7f] (!%p1681_p10), %vm1511_vm7, %v1504_v30 }
 0xe10   : > { %1506 = vst.msk [vmem:[#allocation2] sm:$0xff] %vm536_vm2, %v1505_v31 }
 0xe11 PF: > { %s2477_s12 = sld [smem:[#allocation10_spill]]  ;;  %s2478_s30 = smov %s2027_s10 }
 0xe12   : > { %s2479_s10 = smov %s2031_s11  ;;  %s2480_s11 = smov %s2169_s24 }
 0xe17   : > { %p20_p1 = scmp.ge.s32.totalorder %s2477_s12, 4  }
 0xe19   :  { %22 = sbr.rel (!%p20_p1) target bundleno = 6 (0x6), region = 125 }
 0xe20   :  { %1526 = vsyncpa [#allocation5], 1 }
 0xe21   :  { %1528 = vsyncpa [#allocation5 + $0x1], 1 }
 0xe22   :  { %1529 = vsyncpa [#allocation7], 1 }
 0xe23   :  { %1531 = vsyncpa [#allocation7 + $0x1], 1 }

</bundles_post_ra>
